<compile_context>
chip_gen: v7x
topology: tpu7x:2x2x1
jax: 0.10.0
libtpu: 0.0.40
codegen_flags: <defaults>
</compile_context>

<pallas_src>
import functools

import jax
import jax.numpy as jnp
from jax.experimental import pallas as pl
from jax.experimental.pallas import tpu as pltpu


def _round_up(x, m):
    return ((x + m - 1) // m) * m


def _choose_tile_l(L, B, H):
    """L-tile: multiple of 128, ~<= 8 MiB of enc per block (double-buffered)."""
    row_bytes = B * H * 4
    budget = 8 * 1024 * 1024
    tl = (budget // row_bytes) // 128 * 128
    tl = max(128, min(512, tl))
    return min(tl, _round_up(L, 128))


def attn_general_kernel(hidden_ref, w_ref, bias_ref, enc_ref, out_ref,
                        v_ref, c_ref, *, seq_len):
    """hidden_ref: [B,H]; w_ref: [H,H] (nn.Linear weight, [out,in]);
    bias_ref: [1,H]; enc_ref: [TL,B,H] (seq-major tile of encoder_outputs);
    out_ref: [B,Lp] (resident across the L grid axis);
    v_ref: [B,H] scratch (hidden @ W); c_ref: [B,1] scratch (hidden . bias)."""
    t = pl.program_id(0)
    tl = enc_ref.shape[0]

    # Fold the Linear into the (tiny) hidden vector once, on the first L tile.
    @pl.when(t == 0)
    def _():
        hid = hidden_ref[...].astype(jnp.float32)
        v_ref[...] = jnp.dot(hid, w_ref[...].astype(jnp.float32),
                             preferred_element_type=jnp.float32)
        c_ref[...] = jnp.sum(hid * bias_ref[...].astype(jnp.float32),
                             axis=-1, keepdims=True)

    # scores[l, b] = enc[l, b, :] . v[b, :]   (single streaming pass over enc)
    enc_blk = enc_ref[...].astype(jnp.float32)          # [TL, B, H]
    s = jnp.sum(enc_blk * v_ref[...], axis=-1)          # [TL, B]
    s_bt = s.T + c_ref[...]                             # [B, TL] (+ bias term)

    col0 = pl.multiple_of(t * tl, 128)
    out_ref[:, pl.ds(col0, tl)] = s_bt                  # lane-dense aligned store

    # Softmax over the full resident score row on the last L tile.
    @pl.when(t == pl.num_programs(0) - 1)
    def _():
        scores = out_ref[...]                           # [B, Lp]
        valid = jax.lax.broadcasted_iota(jnp.int32, scores.shape, 1) < seq_len
        scores = jnp.where(valid, scores, -jnp.inf)
        m = jnp.max(scores, axis=-1, keepdims=True)
        e = jnp.exp(scores - m)
        denom = jnp.sum(e, axis=-1, keepdims=True)
        out_ref[...] = e * pl.reciprocal(denom, approx=True)


def attn_general(hidden, encoder_outputs, W, b):
    """hidden: [1,B,H]; encoder_outputs: [L,B,H]; W: [H,H]; b: [H] -> [B,1,L]."""
    _, B, H = hidden.shape
    L = encoder_outputs.shape[0]

    TL = _choose_tile_l(L, B, H)
    Lp = _round_up(L, TL)
    enc = encoder_outputs
    if Lp != L:
        # Zero-pad the L axis so every tile is full; padded positions are
        # masked to -inf before the in-kernel softmax.
        enc = jnp.pad(enc, ((0, Lp - L), (0, 0), (0, 0)))

    h2d = hidden[0]                    # [B, H]  (tiny slice, no big transpose)
    bias2d = b.reshape(1, H)           # [1, H]

    grid_spec = pltpu.PrefetchScalarGridSpec(
        num_scalar_prefetch=0,
        grid=(Lp // TL,),
        in_specs=[
            pl.BlockSpec((B, H), lambda t: (0, 0)),          # hidden (resident)
            pl.BlockSpec((H, H), lambda t: (0, 0)),          # W      (resident)
            pl.BlockSpec((1, H), lambda t: (0, 0)),          # bias   (resident)
            pl.BlockSpec((TL, B, H), lambda t: (t, 0, 0)),   # enc (streamed)
        ],
        out_specs=pl.BlockSpec((B, Lp), lambda t: (0, 0)),   # resident output
        scratch_shapes=[
            pltpu.VMEM((B, H), jnp.float32),   # v = hidden @ W
            pltpu.VMEM((B, 1), jnp.float32),   # c = hidden . bias
        ],
    )

    out = pl.pallas_call(
        functools.partial(attn_general_kernel, seq_len=L),
        out_shape=jax.ShapeDtypeStruct((B, Lp), jnp.float32),
        grid_spec=grid_spec,
        compiler_params=pltpu.CompilerParams(
            dimension_semantics=("arbitrary",),   # softmax reduction over L
            vmem_limit_bytes=64 * 1024 * 1024,
        ),
    )(h2d, W, bias2d, enc)

    return out[:, :L].reshape(B, 1, L)


def attn_general_ref(hidden, encoder_outputs, W, b):
    """Pure-JAX reference mirroring the PyTorch 'general' code path."""
    energy = jnp.einsum("lbh,oh->lbo", encoder_outputs, W) + b   # nn.Linear
    scores = jnp.sum(hidden * energy, axis=2)                    # [L, B]
    scores = scores.T                                            # [B, L]
    return jax.nn.softmax(scores, axis=1)[:, None, :]            # [B, 1, L]


if __name__ == "__main__":
    B, L, H = 2, 8, 32

    key = jax.random.PRNGKey(0)
    k1, k2, k3, k4 = jax.random.split(key, 4)
    hidden = jax.random.normal(k1, (1, B, H), dtype=jnp.float32)
    encoder_outputs = jax.random.normal(k2, (L, B, H), dtype=jnp.float32)
    # deterministic Linear(H, H) parameters (synthetic, not from a checkpoint)
    W = jax.random.normal(k3, (H, H), dtype=jnp.float32) * 0.1
    b = jax.random.normal(k4, (H,), dtype=jnp.float32) * 0.1

    out = attn_general(hidden, encoder_outputs, W, b)
    out = jax.block_until_ready(out)

    ref = attn_general_ref(hidden, encoder_outputs, W, b)
    assert out.shape == (B, 1, L), out.shape
    # approx=True reciprocal (EUP) => slightly looser tolerance than exact div.
    assert jnp.allclose(out, ref, atol=1e-3, rtol=1e-3), "mismatch vs reference"

    # TODO(synk): 'dot' and 'concat' scoring variants not implemented; the
    # 'general' path (Linear fold + reduce + softmax) is the implemented hot path.
    print("KERNEL_OK")
</pallas_src>

<mosaic_0001>
module attributes {stable_mosaic.version = 11 : i64} {
  func.func @attn_general_kernel(%arg0: i32, %arg1: memref<2x32xf32, #tpu.memory_space<vmem>>, %arg2: memref<32x32xf32, #tpu.memory_space<vmem>>, %arg3: memref<1x32xf32, #tpu.memory_space<vmem>>, %arg4: memref<128x2x32xf32, #tpu.memory_space<vmem>>, %arg5: memref<2x128xf32, #tpu.memory_space<vmem>>, %arg6: memref<2x32xf32, #tpu.memory_space<vmem>>, %arg7: memref<2x1xf32, #tpu.memory_space<vmem>>) attributes {dimension_semantics = [#tpu.dimension_semantics<arbitrary>], iteration_bounds = array<i64: 1>, scalar_prefetch = 0 : i64, scratch_operands = 2 : i64, tpu.core_type = #tpu.core_type<tc>, window_params = [{pipeline_mode = #tpu.pipeline_mode<synchronous>, transform_indices = @transform_0, window_bounds = array<i64: 2, 32>}, {pipeline_mode = #tpu.pipeline_mode<synchronous>, transform_indices = @transform_1, window_bounds = array<i64: 32, 32>}, {pipeline_mode = #tpu.pipeline_mode<synchronous>, transform_indices = @transform_2, window_bounds = array<i64: 1, 32>}, {transform_indices = @transform_3, window_bounds = array<i64: 128, 2, 32>}, {pipeline_mode = #tpu.pipeline_mode<synchronous>, transform_indices = @transform_4, window_bounds = array<i64: 2, 128>}]} {
    %c0_i32 = arith.constant 0 : i32
    %0 = arith.cmpi eq, %arg0, %c0_i32 : i32
    %1 = arith.extui %0 : i1 to i32
    %c0_i32_0 = arith.constant 0 : i32
    %2 = arith.cmpi ne, %1, %c0_i32_0 : i32
    scf.if %2 {
      %c0_10 = arith.constant 0 : index
      %c0_11 = arith.constant 0 : index
      %20 = vector.load %arg1[%c0_10, %c0_11] : memref<2x32xf32, #tpu.memory_space<vmem>>, vector<2x32xf32>
      %c0_12 = arith.constant 0 : index
      %c0_13 = arith.constant 0 : index
      %21 = vector.load %arg2[%c0_12, %c0_13] : memref<32x32xf32, #tpu.memory_space<vmem>>, vector<32x32xf32>
      %cst_14 = arith.constant dense<0.000000e+00> : vector<2x32xf32>
      %22 = tpu.matmul %20, %21, %cst_14 {dimension_numbers = #tpu.dot_dimension_numbers<[1], [0], [0], [1], [0, 0, 1, 1], [], []>} : vector<2x32xf32>, vector<32x32xf32>, vector<2x32xf32> -> vector<2x32xf32>
      %c0_15 = arith.constant 0 : index
      %c0_16 = arith.constant 0 : index
      %23 = vector.load %arg6[%c0_15, %c0_16] : memref<2x32xf32, #tpu.memory_space<vmem>>, vector<2x32xf32>
      tpu.vector_store %arg6[%c0_15, %c0_16], %22 {strides = array<i32>} : memref<2x32xf32, #tpu.memory_space<vmem>>, vector<2x32xf32>,
      %c0_17 = arith.constant 0 : index
      %c0_18 = arith.constant 0 : index
      %24 = vector.load %arg3[%c0_17, %c0_18] : memref<1x32xf32, #tpu.memory_space<vmem>>, vector<1x32xf32>
      %25 = vector.broadcast %24 : vector<1x32xf32> to vector<2x32xf32>
      %26 = arith.mulf %20, %25 : vector<2x32xf32>
      %cst_19 = arith.constant dense<0.000000e+00> : vector<2xf32>
      %27 = vector.multi_reduction <add>, %26, %cst_19 [1] : vector<2x32xf32> to vector<2xf32>
      %28 = vector.shape_cast %27 : vector<2xf32> to vector<2x1xf32>
      %c0_20 = arith.constant 0 : index
      %c0_21 = arith.constant 0 : index
      %29 = vector.load %arg7[%c0_20, %c0_21] : memref<2x1xf32, #tpu.memory_space<vmem>>, vector<2x1xf32>
      tpu.vector_store %arg7[%c0_20, %c0_21], %28 {strides = array<i32>} : memref<2x1xf32, #tpu.memory_space<vmem>>, vector<2x1xf32>,
    } else {
    }
    %c0 = arith.constant 0 : index
    %c0_1 = arith.constant 0 : index
    %c0_2 = arith.constant 0 : index
    %3 = vector.load %arg4[%c0, %c0_1, %c0_2] : memref<128x2x32xf32, #tpu.memory_space<vmem>>, vector<128x2x32xf32>
    %c0_3 = arith.constant 0 : index
    %c0_4 = arith.constant 0 : index
    %4 = vector.load %arg6[%c0_3, %c0_4] : memref<2x32xf32, #tpu.memory_space<vmem>>, vector<2x32xf32>
    %5 = vector.shape_cast %4 : vector<2x32xf32> to vector<1x2x32xf32>
    %6 = vector.broadcast %5 : vector<1x2x32xf32> to vector<128x2x32xf32>
    %7 = arith.mulf %3, %6 : vector<128x2x32xf32>
    %cst = arith.constant dense<0.000000e+00> : vector<128x2xf32>
    %8 = vector.multi_reduction <add>, %7, %cst [2] : vector<128x2x32xf32> to vector<128x2xf32>
    %9 = tpu.transpose %8, [1, 0] : vector<128x2xf32> -> vector<2x128xf32>
    %c0_5 = arith.constant 0 : index
    %c0_6 = arith.constant 0 : index
    %10 = vector.load %arg7[%c0_5, %c0_6] : memref<2x1xf32, #tpu.memory_space<vmem>>, vector<2x1xf32>
    %11 = vector.broadcast %10 : vector<2x1xf32> to vector<2x128xf32>
    %12 = arith.addf %9, %11 : vector<2x128xf32>
    %c128_i32 = arith.constant 128 : i32
    %13 = arith.muli %arg0, %c128_i32 : i32
    %14 = tpu.assume_multiple %13, 128 : i32
    %c0_7 = arith.constant 0 : index
    %15 = arith.index_cast %14 : i32 to index
    %16 = vector.load %arg5[%c0_7, %15] : memref<2x128xf32, #tpu.memory_space<vmem>>, vector<2x128xf32>
    tpu.vector_store %arg5[%c0_7, %15], %12 {strides = array<i32>} : memref<2x128xf32, #tpu.memory_space<vmem>>, vector<2x128xf32>,
    %c0_i32_8 = arith.constant 0 : i32
    %17 = arith.cmpi eq, %arg0, %c0_i32_8 : i32
    %18 = arith.extui %17 : i1 to i32
    %c0_i32_9 = arith.constant 0 : i32
    %19 = arith.cmpi ne, %18, %c0_i32_9 : i32
    scf.if %19 {
      %c0_10 = arith.constant 0 : index
      %c0_11 = arith.constant 0 : index
      %20 = vector.load %arg5[%c0_10, %c0_11] : memref<2x128xf32, #tpu.memory_space<vmem>>, vector<2x128xf32>
      %21 = tpu.iota {dimensions = array<i32: 1>} : vector<2x128xi32>
      %c8_i32 = arith.constant 8 : i32
      %22 = vector.broadcast %c8_i32 : i32 to vector<2x128xi32>
      %23 = arith.cmpi slt, %21, %22 : vector<2x128xi32>
      %cst_12 = arith.constant 0xFF800000 : f32
      %24 = vector.broadcast %cst_12 : f32 to vector<2x128xf32>
      %25 = arith.select %23, %20, %24 : vector<2x128xi1>, vector<2x128xf32>
      %cst_13 = arith.constant dense<0xFF800000> : vector<2xf32>
      %26 = vector.multi_reduction <maximumf>, %25, %cst_13 [1] : vector<2x128xf32> to vector<2xf32>
      %27 = vector.shape_cast %26 : vector<2xf32> to vector<2x1xf32>
      %28 = vector.broadcast %27 : vector<2x1xf32> to vector<2x128xf32>
      %29 = arith.subf %25, %28 : vector<2x128xf32>
      %30 = math.exp %29 : vector<2x128xf32>
      %cst_14 = arith.constant dense<0.000000e+00> : vector<2xf32>
      %31 = vector.multi_reduction <add>, %30, %cst_14 [1] : vector<2x128xf32> to vector<2xf32>
      %32 = vector.shape_cast %31 : vector<2xf32> to vector<2x1xf32>
      %33 = tpu.reciprocal %32 {approx = true} : vector<2x1xf32> -> vector<2x1xf32>
      %34 = vector.broadcast %33 : vector<2x1xf32> to vector<2x128xf32>
      %35 = arith.mulf %30, %34 : vector<2x128xf32>
      %c0_15 = arith.constant 0 : index
      %c0_16 = arith.constant 0 : index
      %36 = vector.load %arg5[%c0_15, %c0_16] : memref<2x128xf32, #tpu.memory_space<vmem>>, vector<2x128xf32>
      tpu.vector_store %arg5[%c0_15, %c0_16], %35 {strides = array<i32>} : memref<2x128xf32, #tpu.memory_space<vmem>>, vector<2x128xf32>,
    } else {
    }
    return
  }
  func.func @transform_0(%arg0: i32) -> (i32, i32) {
    %c0_i32 = arith.constant 0 : i32
    %c0_i32_0 = arith.constant 0 : i32
    %c0_i32_1 = arith.constant 0 : i32
    return %c0_i32, %c0_i32_0 : i32, i32
  }
  func.func @transform_1(%arg0: i32) -> (i32, i32) {
    %c0_i32 = arith.constant 0 : i32
    %c0_i32_0 = arith.constant 0 : i32
    %c0_i32_1 = arith.constant 0 : i32
    return %c0_i32, %c0_i32_0 : i32, i32
  }
  func.func @transform_2(%arg0: i32) -> (i32, i32) {
    %c0_i32 = arith.constant 0 : i32
    %c0_i32_0 = arith.constant 0 : i32
    %c0_i32_1 = arith.constant 0 : i32
    return %c0_i32, %c0_i32_0 : i32, i32
  }
  func.func @transform_3(%arg0: i32) -> (i32, i32, i32) {
    %c0_i32 = arith.constant 0 : i32
    %c0_i32_0 = arith.constant 0 : i32
    %c0_i32_1 = arith.constant 0 : i32
    return %arg0, %c0_i32, %c0_i32_0 : i32, i32, i32
  }
  func.func @transform_4(%arg0: i32) -> (i32, i32) {
    %c0_i32 = arith.constant 0 : i32
    %c0_i32_0 = arith.constant 0 : i32
    %c0_i32_1 = arith.constant 0 : i32
    return %c0_i32, %c0_i32_0 : i32, i32
  }
}

</mosaic_0001>

<bundles_post_ra>
// kernel: tpu_custom_call.1
= control target key start
LH: loop header
LB: loop body
LE: loop exit
PB: predicated region body
PF: predicated region fallthrough
CT: control target
= control target key end

     0   :  { %9 = vsyncpa [#allocation5], 0  ;;  %s2542_s0 = inlined_call_operand.hbm [shape: f32[2,32], index: 0, kind: input, shape index: {}]   ;;  %s2543_s1 = inlined_call_operand.hbm [shape: f32[32,32], index: 1, kind: input, shape index: {}]   ;;  %s2544_s2 = inlined_call_operand.hbm [shape: f32[1,32], index: 2, kind: input, shape index: {}]   ;;  %s2545_s3 = inlined_call_operand.hbm [shape: f32[128,2,32], index: 3, kind: input, shape index: {}]   ;;  %s2546_s4 = inlined_call_operand.hbm [shape: f32[2,128], index: 4, kind: output, shape index: {}]  }
   0x1   :  { %10 = vsyncpa [#allocation8], 0 }
   0x2   :  { %11 = vsyncpa [#allocation11], 0 }
   0x3   :  { %12 = vsyncpa [#allocation6], 0  ;;  %s1829_s15 = smov [#allocation7]   ;;  %s1711_s19 = scalar_lea.hbm %s2543_s1, 512 }
   0x4   :  { %s28_s16 = sshll.u32 %s1829_s15, 4  ;;  %p1712_p0 = scmp.ne.s32.totalorder %s2543_s1, %s1711_s19  ;;  %s29_s16 = int_to_ptr.vmem [resolvable:$true] %s28_s16 }
   0x5   :  { %p1715_p1 = scmp.lt.u32.totalorder %s1711_s19, %s2543_s1 }
   0x7   :  { %p1717_p2 = pnand %p1715_p1, %p1712_p0 }
   0x9   :  { %1720 = shalt.err (!%p1717_p2)
}
   0xa   :  { %s1721_s24 = scalar_lea.vmem %s29_s16, 512  ;;  %p1726_p4 = scmp.lt.s32.totalorder %s29_s16, %s29_s16 }
   0xb   :  { %p1722_p3 = scmp.ne.s32.totalorder %s29_s16, %s1721_s24  ;;  %p1727_p5 = scmp.lt.s32.totalorder %s1721_s24, %s1721_s24 }
   0xd   :  { %p1728_p6 = por %p1727_p5, %p1726_p4 }
   0xf   :  { %p1729_p7 = pnand %p1728_p6, %p1722_p3 }
  0x11   :  { %1732 = shalt.err (!%p1729_p7)
}
  0x12   :  { %s1830_s25 = smov 128   ;;  %s1831_s26 = smov 8  }
  0x13   :  { %34 = dma.hbm_to_vmem [thread:$0]  %s2543_s1, 512, %s29_s16, [#allocation8], %s1830_s25, %s1830_s25, %s1831_s26  }
  0x14   :  { %s1832_s29 = smov [#allocation4]   ;;  %s1833_s5 = smov [#allocation9]  }
  0x15   :  { %s19_s30 = sshll.u32 %s1832_s29, 4  ;;  %s41_s6 = sshll.u32 %s1833_s5, 4  ;;  %s20_s30 = int_to_ptr.vmem [resolvable:$true] %s19_s30  ;;  %s42_s6 = int_to_ptr.vmem [resolvable:$true] %s41_s6 }
  0x16   :  { %s1733_s9 = scalar_lea.hbm %s2542_s0, 32 }
  0x17   :  { %p1734_p8 = scmp.ne.s32.totalorder %s2542_s0, %s1733_s9  ;;  %p1737_p9 = scmp.lt.u32.totalorder %s1733_s9, %s2542_s0 }
  0x19   :  { %p1739_p10 = pnand %p1737_p9, %p1734_p8 }
  0x1b   :  { %1742 = shalt.err (!%p1739_p10)
}
  0x1c   :  { %s1743_s1 = scalar_lea.vmem %s20_s30, 32  ;;  %p1748_p12 = scmp.lt.s32.totalorder %s20_s30, %s20_s30 }
  0x1d   :  { %p1744_p11 = scmp.ne.s32.totalorder %s20_s30, %s1743_s1  ;;  %p1749_p13 = scmp.lt.s32.totalorder %s1743_s1, %s1743_s1 }
  0x1f   :  { %p1750_p0 = por %p1749_p13, %p1748_p12 }
  0x21   :  { %p1751_p1 = pnand %p1750_p0, %p1744_p11 }
  0x23   :  { %1754 = shalt.err (!%p1751_p1)
}
  0x24   :  { %22 = dma.hbm_to_vmem [thread:$0]  %s2542_s0, 32, %s20_s30, [#allocation5]  }
  0x25   :  { %s1755_s18 = scalar_lea.hbm %s2544_s2, 16 }
  0x26   :  { %p1756_p2 = scmp.ne.s32.totalorder %s2544_s2, %s1755_s18  ;;  %p1759_p3 = scmp.lt.u32.totalorder %s1755_s18, %s2544_s2 }
  0x28   :  { %p1761_p4 = pnand %p1759_p3, %p1756_p2 }
  0x2a   :  { %1764 = shalt.err (!%p1761_p4)
}
  0x2b   :  { %s1765_s23 = scalar_lea.vmem %s42_s6, 16  ;;  %s1769_s24 = scalar_lea.vmem %s42_s6, 32 }
  0x2c   :  { %p1766_p5 = scmp.ne.s32.totalorder %s42_s6, %s1765_s23  ;;  %p1770_p6 = scmp.lt.s32.totalorder %s42_s6, %s42_s6 }
  0x2d   :  { %p1771_p7 = scmp.lt.s32.totalorder %s1769_s24, %s1765_s23 }
  0x2f   :  { %p1772_p8 = por %p1771_p7, %p1770_p6 }
  0x31   :  { %p1773_p9 = pnand %p1772_p8, %p1766_p5 }
  0x33   :  { %1776 = shalt.err (!%p1773_p9)
}
  0x34   :  { %44 = dma.hbm_to_vmem [thread:$0]  %s2544_s2, 16, %s42_s6, [#allocation8]  }
  0x35   :  { %s1834_s26 = smov [#allocation10]   ;;  %s1777_s30 = scalar_lea.hbm %s2545_s3, 4096 }
  0x36   :  { %s50_s27 = sshll.u32 %s1834_s26, 4  ;;  %p1778_p10 = scmp.ne.s32.totalorder %s2545_s3, %s1777_s30  ;;  %s51_s27 = int_to_ptr.vmem [resolvable:$true] %s50_s27 }
  0x37   :  { %p1781_p11 = scmp.lt.u32.totalorder %s1777_s30, %s2545_s3 }
  0x39   :  { %p1783_p12 = pnand %p1781_p11, %p1778_p10 }
  0x3b   :  { %1786 = shalt.err (!%p1783_p12)
}
  0x3c   :  { %s1787_s10 = scalar_lea.vmem %s51_s27, 4096  ;;  %p1792_p0 = scmp.lt.s32.totalorder %s51_s27, %s51_s27 }
  0x3d   :  { %p1788_p13 = scmp.ne.s32.totalorder %s51_s27, %s1787_s10  ;;  %p1793_p1 = scmp.lt.s32.totalorder %s1787_s10, %s1787_s10 }
  0x3f   :  { %p1794_p2 = por %p1793_p1, %p1792_p0 }
  0x41   :  { %p1795_p3 = pnand %p1794_p2, %p1788_p13 }
  0x43   :  { %1798 = shalt.err (!%p1795_p3)
}
  0x44   :  { %s1835_s2 = smov 32   ;;  %s1836_s6 = smov 2  }
  0x45   :  { %56 = dma.hbm_to_vmem [thread:$0]  %s2545_s3, 4096, %s51_s27, [#allocation11], %s1835_s2, %s1835_s2, %s1836_s6  }
  0x46   :  { %1821 = dma.done.wait [#allocation5], 32  }
  0x47   :  { %1822 = vsyncadd [#allocation5], 4294967264 }
  0x48   :  { %1823 = dma.done.wait [#allocation8], 528  }
  0x49   :  { %1824 = vsyncadd [#allocation8], 4294966768 }
  0x4a   :  { %1825 = dma.done.wait [#allocation11], 4096  }
  0x4b   :  { %1826 = vsyncadd [#allocation11], 4294963200  ;;  %v1837_v0 = vmov 0.0|0.0   ;;  %vm1838_vm0 = vmmov 0   ;;  %v1839_v1 = vmov 0.0   ;;  %v74_v2 = vld [vmem:[#allocation7] sm:$0xff] }
  0x4c   :  { %1685 = vmatprep.subr.bf16.mxu0 %v1837_v0  ;;  %1682 = vmatprep.mubr.msk.f32.mxu0 %vm1838_vm0, %v1839_v1  ;;  %v75_v3 = vld [vmem:[#allocation7 + $0x8] sm:$0xff]  ;;  %v76_v4 = vld [vmem:[#allocation7 + $0x10] sm:$0xff]  ;;  %v77_v6 = vld [vmem:[#allocation7 + $0x18] sm:$0xff]  ;;  %vm78_vm1 = vcmask 261120   ;;  %vm152_vm2 = vcmask 254976   ;;  %vm165_vm3 = vcmask 1024  }
  0x4d   :  { %v1686_v5 = vpack.c.bf16 %v75_v3, %v74_v2  ;;  %v1689_v7 = vpack.c.bf16 %v77_v6, %v76_v4  ;;  %v73_v8 = vld [vmem:[#allocation4] sm:$0x3]  ;;  %v1668_v9 = vld [vmem:[#allocation9] ss:$0 sm:$0xff]  ;;  %v168_v14 = vld [vmem:[#allocation10 + $0x2] sm:$0x3] }
  0x4e   :  { %v161_v10 = vmul.f32 %v1668_v9, %v73_v8  ;;  %v167_v15 = vld [vmem:[#allocation10] sm:$0x3]  ;;  %v169_v17 = vld [vmem:[#allocation10 + $0x4] sm:$0x3]  ;;  %v170_v18 = vld [vmem:[#allocation10 + $0x6] sm:$0x3] }
  0x4f   :  { %1687 = vmatpush3.bf16.msra.mxu0 %v1686_v5  ;;  %v171_v25 = vld [vmem:[#allocation10 + $0x8] sm:$0x3]  ;;  %v172_v26 = vld [vmem:[#allocation10 + $0xa] sm:$0x3]  ;;  %v173_v31 = vld [vmem:[#allocation10 + $0xc] sm:$0x3] }
  0x50   :  { %1688 = vmatprep.subr.bf16.mxu0 %v1837_v0  ;;  %v162_v11 = vsel %vm152_vm2, %v161_v10, 0.0  ;;  %v174_v32 = vld [vmem:[#allocation10 + $0xe] sm:$0x3]  ;;  %v175_v37 = vld [vmem:[#allocation10 + $0x10] sm:$0x3]  ;;  %vm1451_vm4 = vcmask 1041409  }
  0x51   :  { %163 = vadd.xlane.f32.xlu0 %v162_v11  ;;  %v176_v38 = vld [vmem:[#allocation10 + $0x12] sm:$0x3]  ;;  %v177_v43 = vld [vmem:[#allocation10 + $0x14] sm:$0x3]  ;;  %v178_v44 = vld [vmem:[#allocation10 + $0x16] sm:$0x3] }
  0x52   :  { %v183_v49 = vld [vmem:[#allocation10 + $0x20] sm:$0x3]  ;;  %v184_v50 = vld [vmem:[#allocation10 + $0x22] sm:$0x3]  ;;  %v179_v55 = vld [vmem:[#allocation10 + $0x18] sm:$0x3] }
  0x53   :  { %1690 = vmatpush3.bf16.msra.mxu0 %v1689_v7  ;;  %v185_v56 = vld [vmem:[#allocation10 + $0x24] sm:$0x3]  ;;  %v180_v61 = vld [vmem:[#allocation10 + $0x1a] sm:$0x3]  ;;  %v186_v62 = vld [vmem:[#allocation10 + $0x26] sm:$0x3] }
  0x54   :  { %v191_v3 = vld [vmem:[#allocation10 + $0x30] sm:$0x3]  ;;  %v192_v4 = vld [vmem:[#allocation10 + $0x32] sm:$0x3]  ;;  %v181_v10 = vld [vmem:[#allocation10 + $0x1c] sm:$0x3] }
  0x55   :  { %v187_v11 = vld [vmem:[#allocation10 + $0x28] sm:$0x3]  ;;  %vm1453_vm5 = vcmask 1042434   ;;  %vm1455_vm6 = vcmask 1043459   ;;  %vm1457_vm7 = vcmask 1044484   ;;  %vm1459_vm8 = vcmask 1045509  }
  0x56   :  { %1683 = vmatmul.mubr.msk.f32.vlgmr.msra.gmra.mrb[0].mxu0 %vm78_vm1, %v73_v8  ;;  %vm1461_vm9 = vcmask 1046534   ;;  %vm1463_vm10 = vcmask 1047559   ;;  %vm1636_vm12 = vcmask 1041408   ;;  %s1841_s3 = smov [#allocation12]  }
  0x57   :  { %s1655_s13 = sshll.u32 %s1841_s3, 4  ;;  %s1656_s13 = int_to_ptr.vmem [resolvable:$true] %s1655_s13 }
  0x58   :  { %s1799_s1 = scalar_lea.vmem %s1656_s13, 32  ;;  %p1804_p5 = scmp.lt.s32.totalorder %s1656_s13, %s1656_s13 }
  0x59   :  { %p1800_p4 = scmp.ne.s32.totalorder %s1656_s13, %s1799_s1  ;;  %p1805_p6 = scmp.lt.s32.totalorder %s1799_s1, %s1799_s1 }
  0x5b   :  { %p1806_p7 = por %p1805_p6, %p1804_p5 }
  0x5d   :  { %p1807_p8 = pnand %p1806_p7, %p1800_p4 }
  0xde   :  { %v164_v5 = vpop.xlane.xlu0 %163 }
  0xdf   :  { %166 = vst.msk [vmem:[#allocation3] sm:$0x3] %vm165_vm3, %v164_v5 }
 0x129   :  { %v148_v12 = vpop.f32.mrb[0].mxu0 }
 0x12a   :  { %153 = vst.msk [vmem:[#allocation2] sm:$0x3] %vm152_vm2, %v148_v12  ;;  %v1684_v13 = vpop.f32.mrb[1].mxu0 }
 0x131   :  { %v1917_v16 = vld [vmem:[#allocation2] sm:$0x3] }
 0x132   :  { %v297_v19 = vmul.f32 %v1917_v16, %v168_v14  ;;  %v296_v20 = vmul.f32 %v1917_v16, %v167_v15  ;;  %v298_v23 = vmul.f32 %v1917_v16, %v169_v17  ;;  %v299_v24 = vmul.f32 %v1917_v16, %v170_v18  ;;  %v193_v17 = vld [vmem:[#allocation10 + $0x34] sm:$0x3]  ;;  %v182_v18 = vld [vmem:[#allocation10 + $0x1e] sm:$0x3] }
 0x133   :  { %v300_v29 = vmul.f32 %v1917_v16, %v171_v25  ;;  %v301_v30 = vmul.f32 %v1917_v16, %v172_v26  ;;  %v302_v35 = vmul.f32 %v1917_v16, %v173_v31  ;;  %v303_v36 = vmul.f32 %v1917_v16, %v174_v32 }
 0x134   :  { %v428_v21 = vsel %vm152_vm2, %v297_v19, 0.0  ;;  %v425_v22 = vsel %vm152_vm2, %v296_v20, 0.0  ;;  %v431_v27 = vsel %vm152_vm2, %v298_v23, 0.0  ;;  %v434_v28 = vsel %vm152_vm2, %v299_v24, 0.0  ;;  %v188_v23 = vld [vmem:[#allocation10 + $0x2a] sm:$0x3] }
 0x135   :  { %429 = vadd.xlane.f32.xlu1 %v428_v21  ;;  %426 = vadd.xlane.f32.xlu0 %v425_v22  ;;  %v437_v33 = vsel %vm152_vm2, %v300_v29, 0.0  ;;  %v440_v34 = vsel %vm152_vm2, %v301_v30, 0.0  ;;  %v443_v39 = vsel %vm152_vm2, %v302_v35, 0.0  ;;  %v446_v40 = vsel %vm152_vm2, %v303_v36, 0.0  ;;  %v194_v24 = vld [vmem:[#allocation10 + $0x36] sm:$0x3] }
 0x136   :  { %v304_v41 = vmul.f32 %v1917_v16, %v175_v37  ;;  %v305_v42 = vmul.f32 %v1917_v16, %v176_v38  ;;  %v306_v47 = vmul.f32 %v1917_v16, %v177_v43  ;;  %v307_v48 = vmul.f32 %v1917_v16, %v178_v44  ;;  %v199_v29 = vld [vmem:[#allocation10 + $0x40] sm:$0x3]  ;;  %v200_v30 = vld [vmem:[#allocation10 + $0x42] sm:$0x3]  ;;  %v189_v35 = vld [vmem:[#allocation10 + $0x2c] sm:$0x3] }
 0x137   :  { %v312_v53 = vmul.f32 %v1917_v16, %v183_v49  ;;  %v313_v54 = vmul.f32 %v1917_v16, %v184_v50  ;;  %v308_v59 = vmul.f32 %v1917_v16, %v179_v55  ;;  %v314_v60 = vmul.f32 %v1917_v16, %v185_v56  ;;  %v195_v36 = vld [vmem:[#allocation10 + $0x38] sm:$0x3] }
 0x138   :  { %v449_v45 = vsel %vm152_vm2, %v304_v41, 0.0  ;;  %v452_v46 = vsel %vm152_vm2, %v305_v42, 0.0  ;;  %v455_v51 = vsel %vm152_vm2, %v306_v47, 0.0  ;;  %v458_v52 = vsel %vm152_vm2, %v307_v48, 0.0  ;;  %v201_v41 = vld [vmem:[#allocation10 + $0x44] sm:$0x3] }
 0x139   :  { %432 = vadd.xlane.f32.xlu1 %v431_v27  ;;  %435 = vadd.xlane.f32.xlu0 %v434_v28  ;;  %v473_v57 = vsel %vm152_vm2, %v312_v53, 0.0  ;;  %v476_v58 = vsel %vm152_vm2, %v313_v54, 0.0  ;;  %v461_v63 = vsel %vm152_vm2, %v308_v59, 0.0  ;;  %v479_v0 = vsel %vm152_vm2, %v314_v60, 0.0  ;;  %v190_v42 = vld [vmem:[#allocation10 + $0x2e] sm:$0x3] }
 0x13a   :  { %v309_v1 = vmul.f32 %v1917_v16, %v180_v61  ;;  %v315_v2 = vmul.f32 %v1917_v16, %v186_v62  ;;  %v320_v8 = vmul.f32 %v1917_v16, %v191_v3  ;;  %v321_v9 = vmul.f32 %v1917_v16, %v192_v4  ;;  %v196_v47 = vld [vmem:[#allocation10 + $0x3a] sm:$0x3]  ;;  %v202_v48 = vld [vmem:[#allocation10 + $0x46] sm:$0x3]  ;;  %v207_v53 = vld [vmem:[#allocation10 + $0x50] sm:$0x3] }
 0x13b   :  { %v310_v14 = vmul.f32 %v1917_v16, %v181_v10  ;;  %v316_v15 = vmul.f32 %v1917_v16, %v187_v11  ;;  %v322_v21 = vmul.f32 %v1917_v16, %v193_v17  ;;  %v311_v22 = vmul.f32 %v1917_v16, %v182_v18  ;;  %v208_v54 = vld [vmem:[#allocation10 + $0x52] sm:$0x3]  ;;  %v197_v59 = vld [vmem:[#allocation10 + $0x3c] sm:$0x3]  ;;  %v203_v60 = vld [vmem:[#allocation10 + $0x48] sm:$0x3] }
 0x13c   :  { %v464_v6 = vsel %vm152_vm2, %v309_v1, 0.0  ;;  %v482_v7 = vsel %vm152_vm2, %v315_v2, 0.0  ;;  %v497_v12 = vsel %vm152_vm2, %v320_v8, 0.0  ;;  %v500_v13 = vsel %vm152_vm2, %v321_v9, 0.0  ;;  %v209_v1 = vld [vmem:[#allocation10 + $0x54] sm:$0x3] }
 0x13d   :  { %438 = vadd.xlane.f32.xlu1 %v437_v33  ;;  %441 = vadd.xlane.f32.xlu0 %v440_v34  ;;  %v467_v19 = vsel %vm152_vm2, %v310_v14, 0.0  ;;  %v485_v20 = vsel %vm152_vm2, %v316_v15, 0.0  ;;  %v503_v25 = vsel %vm152_vm2, %v322_v21, 0.0  ;;  %v470_v26 = vsel %vm152_vm2, %v311_v22, 0.0  ;;  %v198_v2 = vld [vmem:[#allocation10 + $0x3e] sm:$0x3] }
 0x13e   :  { %v317_v27 = vmul.f32 %v1917_v16, %v188_v23  ;;  %v323_v28 = vmul.f32 %v1917_v16, %v194_v24  ;;  %v328_v33 = vmul.f32 %v1917_v16, %v199_v29  ;;  %v329_v34 = vmul.f32 %v1917_v16, %v200_v30  ;;  %v210_v8 = vld [vmem:[#allocation10 + $0x56] sm:$0x3]  ;;  %v216_v14 = vld [vmem:[#allocation10 + $0x62] sm:$0x3]  ;;  %v211_v21 = vld [vmem:[#allocation10 + $0x58] sm:$0x3] }
 0x13f   :  { %v338_v5 = vmul.f32 %v1917_v16, %v209_v1 }
 0x140   :  { %v488_v31 = vsel %vm152_vm2, %v317_v27, 0.0  ;;  %v506_v32 = vsel %vm152_vm2, %v323_v28, 0.0  ;;  %v521_v37 = vsel %vm152_vm2, %v328_v33, 0.0  ;;  %v524_v38 = vsel %vm152_vm2, %v329_v34, 0.0  ;;  %v206_v27 = vld [vmem:[#allocation10 + $0x4e] sm:$0x3] }
 0x141   :  { %444 = vadd.xlane.f32.xlu1 %v443_v39  ;;  %447 = vadd.xlane.f32.xlu0 %v446_v40  ;;  %v318_v39 = vmul.f32 %v1917_v16, %v189_v35  ;;  %v324_v40 = vmul.f32 %v1917_v16, %v195_v36  ;;  %v551_v9 = vsel %vm152_vm2, %v338_v5, 0.0  ;;  %v218_v33 = vld [vmem:[#allocation10 + $0x66] sm:$0x3]  ;;  %v227_v5 = vld [vmem:[#allocation10 + $0x78] sm:$0x3] }
 0x143   :  { %v491_v43 = vsel %vm152_vm2, %v318_v39, 0.0  ;;  %v509_v44 = vsel %vm152_vm2, %v324_v40, 0.0  ;;  %v224_v39 = vld [vmem:[#allocation10 + $0x72] sm:$0x3] }
 0x145   :  { %450 = vadd.xlane.f32.xlu1 %v449_v45  ;;  %453 = vadd.xlane.f32.xlu0 %v452_v46  ;;  %v330_v45 = vmul.f32 %v1917_v16, %v201_v41  ;;  %v319_v46 = vmul.f32 %v1917_v16, %v190_v42 }
 0x147   :  { %v527_v49 = vsel %vm152_vm2, %v330_v45, 0.0  ;;  %v494_v50 = vsel %vm152_vm2, %v319_v46, 0.0  ;;  %v219_v45 = vld [vmem:[#allocation10 + $0x68] sm:$0x3] }
 0x149   :  { %456 = vadd.xlane.f32.xlu1 %v455_v51  ;;  %459 = vadd.xlane.f32.xlu0 %v458_v52  ;;  %v325_v51 = vmul.f32 %v1917_v16, %v196_v47  ;;  %v331_v52 = vmul.f32 %v1917_v16, %v202_v48 }
 0x14b   :  { %v512_v55 = vsel %vm152_vm2, %v325_v51, 0.0  ;;  %v530_v56 = vsel %vm152_vm2, %v331_v52, 0.0  ;;  %v214_v51 = vld [vmem:[#allocation10 + $0x5e] sm:$0x3] }
 0x14d   :  { %474 = vadd.xlane.f32.xlu1 %v473_v57  ;;  %477 = vadd.xlane.f32.xlu0 %v476_v58  ;;  %v336_v57 = vmul.f32 %v1917_v16, %v207_v53  ;;  %v337_v58 = vmul.f32 %v1917_v16, %v208_v54 }
 0x14f   :  { %v545_v61 = vsel %vm152_vm2, %v336_v57, 0.0  ;;  %v548_v62 = vsel %vm152_vm2, %v337_v58, 0.0  ;;  %v226_v57 = vld [vmem:[#allocation10 + $0x76] sm:$0x3] }
 0x151   :  { %462 = vadd.xlane.f32.xlu1 %v461_v63  ;;  %480 = vadd.xlane.f32.xlu0 %v479_v0  ;;  %v326_v63 = vmul.f32 %v1917_v16, %v197_v59  ;;  %v332_v0 = vmul.f32 %v1917_v16, %v203_v60 }
 0x153   :  { %v515_v3 = vsel %vm152_vm2, %v326_v63, 0.0  ;;  %v533_v4 = vsel %vm152_vm2, %v332_v0, 0.0  ;;  %v232_v63 = vld [vmem:[#allocation10 + $0x82] sm:$0x3] }
 0x155   :  { %465 = vadd.xlane.f32.xlu1 %v464_v6  ;;  %483 = vadd.xlane.f32.xlu0 %v482_v7  ;;  %v327_v6 = vmul.f32 %v1917_v16, %v198_v2  ;;  %v204_v7 = vld [vmem:[#allocation10 + $0x4a] sm:$0x3] }
 0x156   :  { %v333_v11 = vmul.f32 %v1917_v16, %v204_v7 }
 0x157   :  { %v518_v10 = vsel %vm152_vm2, %v327_v6, 0.0 }
 0x158   :  { %v536_v15 = vsel %vm152_vm2, %v333_v11, 0.0  ;;  %v222_v11 = vld [vmem:[#allocation10 + $0x6e] sm:$0x3] }
 0x159   :  { %498 = vadd.xlane.f32.xlu1 %v497_v12  ;;  %501 = vadd.xlane.f32.xlu0 %v500_v13  ;;  %v339_v12 = vmul.f32 %v1917_v16, %v210_v8  ;;  %v215_v13 = vld [vmem:[#allocation10 + $0x60] sm:$0x3] }
 0x15a   :  { %v344_v18 = vmul.f32 %v1917_v16, %v215_v13 }
 0x15b   :  { %v554_v17 = vsel %vm152_vm2, %v339_v12, 0.0 }
 0x15c   :  { %v569_v22 = vsel %vm152_vm2, %v344_v18, 0.0  ;;  %v234_v18 = vld [vmem:[#allocation10 + $0x86] sm:$0x3] }
 0x15d   :  { %468 = vadd.xlane.f32.xlu1 %v467_v19  ;;  %486 = vadd.xlane.f32.xlu0 %v485_v20  ;;  %v345_v19 = vmul.f32 %v1917_v16, %v216_v14  ;;  %v205_v20 = vld [vmem:[#allocation10 + $0x4c] sm:$0x3] }
 0x15e   :  { %v334_v24 = vmul.f32 %v1917_v16, %v205_v20 }
 0x15f   :  { %v572_v23 = vsel %vm152_vm2, %v345_v19, 0.0 }
 0x160   :  { %v539_v28 = vsel %vm152_vm2, %v334_v24, 0.0  ;;  %v240_v24 = vld [vmem:[#allocation10 + $0x92] sm:$0x3] }
 0x161   :  { %504 = vadd.xlane.f32.xlu1 %v503_v25  ;;  %471 = vadd.xlane.f32.xlu0 %v470_v26  ;;  %v340_v25 = vmul.f32 %v1917_v16, %v211_v21  ;;  %v217_v26 = vld [vmem:[#allocation10 + $0x64] sm:$0x3] }
 0x162   :  { %v346_v30 = vmul.f32 %v1917_v16, %v217_v26 }
 0x163   :  { %v557_v29 = vsel %vm152_vm2, %v340_v25, 0.0 }
 0x164   :  { %v575_v34 = vsel %vm152_vm2, %v346_v30, 0.0  ;;  %v235_v30 = vld [vmem:[#allocation10 + $0x88] sm:$0x3] }
 0x165   :  { %489 = vadd.xlane.f32.xlu1 %v488_v31  ;;  %507 = vadd.xlane.f32.xlu0 %v506_v32  ;;  %v335_v31 = vmul.f32 %v1917_v16, %v206_v27  ;;  %v212_v32 = vld [vmem:[#allocation10 + $0x5a] sm:$0x3] }
 0x166   :  { %v341_v36 = vmul.f32 %v1917_v16, %v212_v32 }
 0x167   :  { %v542_v35 = vsel %vm152_vm2, %v335_v31, 0.0  ;;  %v937_v31 = vlaneseq }
 0x168   :  { %v560_v40 = vsel %vm152_vm2, %v341_v36, 0.0  ;;  %v241_v36 = vld [vmem:[#allocation10 + $0x94] sm:$0x3] }
 0x169   :  { %522 = vadd.xlane.f32.xlu1 %v521_v37  ;;  %525 = vadd.xlane.f32.xlu0 %v524_v38  ;;  %v347_v37 = vmul.f32 %v1917_v16, %v218_v33  ;;  %v223_v38 = vld [vmem:[#allocation10 + $0x70] sm:$0x3] }
 0x16a   :  { %v352_v42 = vmul.f32 %v1917_v16, %v223_v38  ;;  %v2057_v38 = vand.u32 127, %v937_v31 }
 0x16b   :  { %v578_v41 = vsel %vm152_vm2, %v347_v37, 0.0  ;;  %v230_v37 = vld [vmem:[#allocation10 + $0x7e] sm:$0x3] }
 0x16c   :  { %v593_v46 = vsel %vm152_vm2, %v352_v42, 0.0  ;;  %v370_v42 = vmul.f32 %v1917_v16, %v241_v36  ;;  %vm1634_vm11 = vcmp.lt.s32.totalorder %v2057_v38, 8 }
 0x16d   :  { %492 = vadd.xlane.f32.xlu1 %v491_v43  ;;  %510 = vadd.xlane.f32.xlu0 %v509_v44  ;;  %v353_v43 = vmul.f32 %v1917_v16, %v224_v39  ;;  %v213_v44 = vld [vmem:[#allocation10 + $0x5c] sm:$0x3]  ;;  %v940_v39 = vshrl.u32 %v937_v31, 7 }
 0x16e   :  { %v342_v48 = vmul.f32 %v1917_v16, %v213_v44  ;;  %v236_v44 = vld [vmem:[#allocation10 + $0x8a] sm:$0x3] }
 0x16f   :  { %v596_v47 = vsel %vm152_vm2, %v353_v43, 0.0  ;;  %v359_v43 = vmul.f32 %v1917_v16, %v230_v37 }
 0x170   :  { %v563_v52 = vsel %vm152_vm2, %v342_v48, 0.0 }
 0x171   :  { %528 = vadd.xlane.f32.xlu1 %v527_v49  ;;  %495 = vadd.xlane.f32.xlu0 %v494_v50  ;;  %v348_v49 = vmul.f32 %v1917_v16, %v219_v45  ;;  %v225_v50 = vld [vmem:[#allocation10 + $0x74] sm:$0x3]  ;;  %v242_v45 = vld [vmem:[#allocation10 + $0x96] sm:$0x3]  ;;  %v614_v48 = vsel %vm152_vm2, %v359_v43, 0.0 }
 0x172   :  { %v354_v54 = vmul.f32 %v1917_v16, %v225_v50  ;;  %v371_v50 = vmul.f32 %v1917_v16, %v242_v45 }
 0x173   :  { %v581_v53 = vsel %vm152_vm2, %v348_v49, 0.0  ;;  %v365_v49 = vmul.f32 %v1917_v16, %v236_v44 }
 0x174   :  { %v599_v58 = vsel %vm152_vm2, %v354_v54, 0.0 }
 0x175   :  { %513 = vadd.xlane.f32.xlu1 %v512_v55  ;;  %531 = vadd.xlane.f32.xlu0 %v530_v56  ;;  %v343_v55 = vmul.f32 %v1917_v16, %v214_v51  ;;  %v220_v56 = vld [vmem:[#allocation10 + $0x6a] sm:$0x3]  ;;  %v247_v51 = vld [vmem:[#allocation10 + $0xa0] sm:$0x3] }
 0x176   :  { %v349_v60 = vmul.f32 %v1917_v16, %v220_v56 }
 0x177   :  { %v566_v59 = vsel %vm152_vm2, %v343_v55, 0.0  ;;  %v1840_v55 = vmov 0  }
 0x178   :  { %v584_v0 = vsel %vm152_vm2, %v349_v60, 0.0  ;;  %1704 = vset.pattern.permute.xlu1 %v1840_v55  ;;  %v376_v60 = vmul.f32 %v1917_v16, %v247_v51 }
 0x179   :  { %546 = vadd.xlane.f32.xlu1 %v545_v61  ;;  %549 = vadd.xlane.f32.xlu0 %v548_v62  ;;  %v355_v61 = vmul.f32 %v1917_v16, %v226_v57  ;;  %v231_v62 = vld [vmem:[#allocation10 + $0x80] sm:$0x3] }
 0x17a   :  { %v360_v2 = vmul.f32 %v1917_v16, %v231_v62 }
 0x17b   :  { %v602_v1 = vsel %vm152_vm2, %v355_v61, 0.0 }
 0x17c   :  { %v617_v6 = vsel %vm152_vm2, %v360_v2, 0.0 }
 0x17d   :  { %516 = vadd.xlane.f32.xlu1 %v515_v3  ;;  %534 = vadd.xlane.f32.xlu0 %v533_v4  ;;  %v361_v3 = vmul.f32 %v1917_v16, %v232_v63  ;;  %v221_v4 = vld [vmem:[#allocation10 + $0x6c] sm:$0x3] }
 0x17e   :  { %v350_v8 = vmul.f32 %v1917_v16, %v221_v4  ;;  %v237_v63 = vld [vmem:[#allocation10 + $0x8c] sm:$0x3] }
 0x17f   :  { %v620_v7 = vsel %vm152_vm2, %v361_v3, 0.0 }
 0x180   :  { %v587_v12 = vsel %vm152_vm2, %v350_v8, 0.0 }
 0x181   :  { %552 = vadd.xlane.f32.xlu1 %v551_v9  ;;  %519 = vadd.xlane.f32.xlu0 %v518_v10  ;;  %v356_v9 = vmul.f32 %v1917_v16, %v227_v5  ;;  %v233_v10 = vld [vmem:[#allocation10 + $0x84] sm:$0x3]  ;;  %v665_v5 = vsel %vm152_vm2, %v376_v60, 0.0 }
 0x182   :  { %v362_v14 = vmul.f32 %v1917_v16, %v233_v10  ;;  %v249_v10 = vld [vmem:[#allocation10 + $0xa4] sm:$0x3] }
 0x183   :  { %v605_v13 = vsel %vm152_vm2, %v356_v9, 0.0 }
 0x184   :  { %v623_v19 = vsel %vm152_vm2, %v362_v14, 0.0 }
 0x185   :  { %537 = vadd.xlane.f32.xlu1 %v536_v15  ;;  %555 = vadd.xlane.f32.xlu0 %v554_v17  ;;  %v351_v15 = vmul.f32 %v1917_v16, %v222_v11  ;;  %v228_v17 = vld [vmem:[#allocation10 + $0x7a] sm:$0x3]  ;;  %v238_v11 = vld [vmem:[#allocation10 + $0x8e] sm:$0x3] }
 0x186   :  { %v357_v21 = vmul.f32 %v1917_v16, %v228_v17 }
 0x187   :  { %v590_v20 = vsel %vm152_vm2, %v351_v15, 0.0 }
 0x188   :  { %v608_v25 = vsel %vm152_vm2, %v357_v21, 0.0  ;;  %v367_v21 = vmul.f32 %v1917_v16, %v238_v11 }
 0x189   :  { %570 = vadd.xlane.f32.xlu1 %v569_v22  ;;  %573 = vadd.xlane.f32.xlu0 %v572_v23  ;;  %v363_v22 = vmul.f32 %v1917_v16, %v234_v18  ;;  %v239_v23 = vld [vmem:[#allocation10 + $0x90] sm:$0x3] }
 0x18a   :  { %v368_v27 = vmul.f32 %v1917_v16, %v239_v23  ;;  %v244_v23 = vld [vmem:[#allocation10 + $0x9a] sm:$0x3]  ;;  %v638_v31 = vsel %vm152_vm2, %v367_v21, 0.0 }
 0x18b   :  { %v626_v26 = vsel %vm152_vm2, %v363_v22, 0.0 }
 0x18c   :  { %v641_v32 = vsel %vm152_vm2, %v368_v27, 0.0 }
 0x18d   :  { %540 = vadd.xlane.f32.xlu1 %v539_v28  ;;  %558 = vadd.xlane.f32.xlu0 %v557_v29  ;;  %v369_v28 = vmul.f32 %v1917_v16, %v240_v24  ;;  %v229_v29 = vld [vmem:[#allocation10 + $0x7c] sm:$0x3]  ;;  %v250_v24 = vld [vmem:[#allocation10 + $0xa6] sm:$0x3] }
 0x18f   :  { %v644_v33 = vsel %vm152_vm2, %v369_v28, 0.0 }
 0x191   :  { %576 = vadd.xlane.f32.xlu1 %v575_v34  ;;  %543 = vadd.xlane.f32.xlu0 %v542_v35  ;;  %v358_v34 = vmul.f32 %v1917_v16, %v229_v29  ;;  %v364_v35 = vmul.f32 %v1917_v16, %v235_v30 }
 0x195   :  { %561 = vadd.xlane.f32.xlu1 %v560_v40  ;;  %579 = vadd.xlane.f32.xlu0 %v578_v41  ;;  %v611_v40 = vsel %vm152_vm2, %v358_v34, 0.0  ;;  %v629_v41 = vsel %vm152_vm2, %v364_v35, 0.0  ;;  %v255_v34 = vld [vmem:[#allocation10 + $0xb0] sm:$0x3]  ;;  %v256_v35 = vld [vmem:[#allocation10 + $0xb2] sm:$0x3] }
 0x196   :  { %v384_v45 = vmul.f32 %v1917_v16, %v255_v34  ;;  %v259_v34 = vld [vmem:[#allocation10 + $0xb8] sm:$0x3] }
 0x199   :  { %594 = vadd.xlane.f32.xlu1 %v593_v46  ;;  %597 = vadd.xlane.f32.xlu0 %v596_v47  ;;  %v2064_v46 = vsub.s32 %v2057_v38, %v940_v39  ;;  %v647_v47 = vsel %vm152_vm2, %v370_v42, 0.0 }
 0x19d   :  { %564 = vadd.xlane.f32.xlu1 %v563_v52  ;;  %582 = vadd.xlane.f32.xlu0 %v581_v53  ;;  %v248_v52 = vld [vmem:[#allocation10 + $0xa2] sm:$0x3] }
 0x19e   :  { %v377_v61 = vmul.f32 %v1917_v16, %v248_v52 }
 0x1a1   :  { %600 = vadd.xlane.f32.xlu1 %v599_v58  ;;  %567 = vadd.xlane.f32.xlu0 %v566_v59  ;;  %v632_v58 = vsel %vm152_vm2, %v365_v49, 0.0  ;;  %v650_v59 = vsel %vm152_vm2, %v371_v50, 0.0  ;;  %v245_v49 = vld [vmem:[#allocation10 + $0x9c] sm:$0x3]  ;;  %v251_v50 = vld [vmem:[#allocation10 + $0xa8] sm:$0x3] }
 0x1a5   :  { %585 = vadd.xlane.f32.xlu1 %v584_v0  ;;  %603 = vadd.xlane.f32.xlu0 %v602_v1  ;;  %v243_v0 = vld [vmem:[#allocation10 + $0x98] sm:$0x3] }
 0x1a6   :  { %v372_v8 = vmul.f32 %v1917_v16, %v243_v0 }
 0x1a9   :  { %618 = vadd.xlane.f32.xlu1 %v617_v6  ;;  %621 = vadd.xlane.f32.xlu0 %v620_v7  ;;  %v668_v6 = vsel %vm152_vm2, %v377_v61, 0.0  ;;  %v366_v7 = vmul.f32 %v1917_v16, %v237_v63  ;;  %v257_v61 = vld [vmem:[#allocation10 + $0xb4] sm:$0x3] }
 0x1ab   :  { %v635_v18 = vsel %vm152_vm2, %v366_v7, 0.0 }
 0x1ad   :  { %588 = vadd.xlane.f32.xlu1 %v587_v12  ;;  %606 = vadd.xlane.f32.xlu0 %v605_v13 }
 0x1b1   :  { %624 = vadd.xlane.f32.xlu1 %v623_v19  ;;  %591 = vadd.xlane.f32.xlu0 %v590_v20  ;;  %v653_v19 = vsel %vm152_vm2, %v372_v8, 0.0  ;;  %v378_v20 = vmul.f32 %v1917_v16, %v249_v10  ;;  %v258_v10 = vld [vmem:[#allocation10 + $0xb6] sm:$0x3] }
 0x1b3   :  { %v671_v30 = vsel %vm152_vm2, %v378_v20, 0.0 }
 0x1b5   :  { %609 = vadd.xlane.f32.xlu1 %v608_v25  ;;  %627 = vadd.xlane.f32.xlu0 %v626_v26 }
 0x1b9   :  { %642 = vadd.xlane.f32.xlu1 %v641_v32  ;;  %645 = vadd.xlane.f32.xlu0 %v644_v33  ;;  %v373_v32 = vmul.f32 %v1917_v16, %v244_v23  ;;  %v379_v33 = vmul.f32 %v1917_v16, %v250_v24  ;;  %v264_v23 = vld [vmem:[#allocation10 + $0xc2] sm:$0x3] }
 0x1bb   :  { %v656_v43 = vsel %vm152_vm2, %v373_v32, 0.0  ;;  %v674_v44 = vsel %vm152_vm2, %v379_v33, 0.0  ;;  %v253_v33 = vld [vmem:[#allocation10 + $0xac] sm:$0x3] }
 0x1bd   :  { %612 = vadd.xlane.f32.xlu1 %v611_v40  ;;  %630 = vadd.xlane.f32.xlu0 %v629_v41 }
 0x1c1   :  { %648 = vadd.xlane.f32.xlu1 %v647_v47  ;;  %615 = vadd.xlane.f32.xlu0 %v614_v48  ;;  %v385_v47 = vmul.f32 %v1917_v16, %v256_v35 }
 0x1c2   :  { %v430_v53 = vpop.xlane.xlu1 %429  ;;  %v427_v54 = vpop.xlane.xlu0 %426 }
 0x1c3   :  { %v946_v56 = vrot.slane %v430_v53, %v2064_v46  ;;  %v942_v57 = vrot.slane %v427_v54, %v2064_v46 }
 0x1c5   :  { %v1452_v62 = vsel %vm1451_vm4, %v946_v56, %v942_v57  ;;  %633 = vadd.xlane.f32.xlu1 %v632_v58  ;;  %651 = vadd.xlane.f32.xlu0 %v650_v59  ;;  %v689_v56 = vsel %vm152_vm2, %v384_v45, 0.0  ;;  %v692_v57 = vsel %vm152_vm2, %v385_v47, 0.0  ;;  %v374_v58 = vmul.f32 %v1917_v16, %v245_v49  ;;  %v254_v49 = vld [vmem:[#allocation10 + $0xae] sm:$0x3] }
 0x1c6   :  { %v433_v1 = vpop.xlane.xlu1 %432  ;;  %v436_v2 = vpop.xlane.xlu0 %435  ;;  %v380_v59 = vmul.f32 %v1917_v16, %v251_v50  ;;  %v388_v45 = vmul.f32 %v1917_v16, %v259_v34  ;;  %v262_v34 = vld [vmem:[#allocation10 + $0xbe] sm:$0x3] }
 0x1c7   :  { %v950_v3 = vrot.slane %v433_v1, %v2064_v46  ;;  %v954_v4 = vrot.slane %v436_v2, %v2064_v46 }
 0x1c9   :  { %v1454_v9 = vsel %vm1453_vm5, %v950_v3, %v1452_v62  ;;  %666 = vadd.xlane.f32.xlu1 %v665_v5  ;;  %669 = vadd.xlane.f32.xlu0 %v668_v6  ;;  %v246_v62 = vld [vmem:[#allocation10 + $0x9e] sm:$0x3]  ;;  %v677_v5 = vsel %vm152_vm2, %v380_v59, 0.0  ;;  %v386_v6 = vmul.f32 %v1917_v16, %v257_v61  ;;  %v266_v61 = vld [vmem:[#allocation10 + $0xc6] sm:$0x3] }
 0x1ca   :  { %v1456_v12 = vsel %vm1455_vm6, %v954_v4, %v1454_v9  ;;  %v439_v13 = vpop.xlane.xlu1 %438  ;;  %v442_v14 = vpop.xlane.xlu0 %441  ;;  %v659_v4 = vsel %vm152_vm2, %v374_v58, 0.0  ;;  %v375_v7 = vmul.f32 %v1917_v16, %v246_v62  ;;  %v252_v9 = vld [vmem:[#allocation10 + $0xaa] sm:$0x3]  ;;  %v383_v58 = vmul.f32 %v1917_v16, %v254_v49 }
 0x1cb   :  { %v958_v15 = vrot.slane %v439_v13, %v2064_v46  ;;  %v962_v17 = vrot.slane %v442_v14, %v2064_v46 }
 0x1cd   :  { %v1458_v22 = vsel %vm1457_vm7, %v958_v15, %v1456_v12  ;;  %636 = vadd.xlane.f32.xlu1 %v635_v18  ;;  %654 = vadd.xlane.f32.xlu0 %v653_v19  ;;  %v695_v15 = vsel %vm152_vm2, %v386_v6, 0.0  ;;  %v381_v18 = vmul.f32 %v1917_v16, %v252_v9  ;;  %v387_v19 = vmul.f32 %v1917_v16, %v258_v10  ;;  %v272_v9 = vld [vmem:[#allocation10 + $0xd2] sm:$0x3] }
 0x1ce   :  { %v445_v25 = vpop.xlane.xlu1 %444  ;;  %v448_v26 = vpop.xlane.xlu0 %447  ;;  %v1460_v27 = vsel %vm1459_vm8, %v962_v17, %v1458_v22  ;;  %v662_v17 = vsel %vm152_vm2, %v375_v7, 0.0  ;;  %v263_v22 = vld [vmem:[#allocation10 + $0xc0] sm:$0x3]  ;;  %v395_v6 = vmul.f32 %v1917_v16, %v266_v61 }
 0x1cf   :  { %v966_v28 = vrot.slane %v445_v25, %v2064_v46  ;;  %v970_v29 = vrot.slane %v448_v26, %v2064_v46 }
 0x1d1   :  { %672 = vadd.xlane.f32.xlu1 %v671_v30  ;;  %639 = vadd.xlane.f32.xlu0 %v638_v31  ;;  %v1462_v36 = vsel %vm1461_vm9, %v966_v28, %v1460_v27  ;;  %v680_v28 = vsel %vm152_vm2, %v381_v18, 0.0  ;;  %v392_v30 = vmul.f32 %v1917_v16, %v263_v22  ;;  %v393_v31 = vmul.f32 %v1917_v16, %v264_v23  ;;  %v267_v22 = vld [vmem:[#allocation10 + $0xc8] sm:$0x3] }
 0x1d2   :  { %v451_v37 = vpop.xlane.xlu1 %450  ;;  %v454_v39 = vpop.xlane.xlu0 %453  ;;  %v2102_v40 = vsel %vm1463_vm10, %v970_v29, %v1462_v36  ;;  %v698_v29 = vsel %vm152_vm2, %v387_v19, 0.0  ;;  %v401_v19 = vmul.f32 %v1917_v16, %v272_v9 }
 0x1d3   :  { %v974_v41 = vrot.slane %v451_v37, %v2064_v46  ;;  %v978_v42 = vrot.slane %v454_v39, %v2064_v46 }
 0x1d5   :  { %v1465_v48 = vsel %vm1451_vm4, %v978_v42, %v974_v41  ;;  %657 = vadd.xlane.f32.xlu1 %v656_v43  ;;  %675 = vadd.xlane.f32.xlu0 %v674_v44  ;;  %v713_v42 = vsel %vm152_vm2, %v392_v30, 0.0  ;;  %v716_v43 = vsel %vm152_vm2, %v393_v31, 0.0  ;;  %v382_v44 = vmul.f32 %v1917_v16, %v253_v33  ;;  %v273_v33 = vld [vmem:[#allocation10 + $0xd4] sm:$0x3] }
 0x1d6   :  { %v457_v51 = vpop.xlane.xlu1 %456  ;;  %v460_v52 = vpop.xlane.xlu0 %459  ;;  %v396_v31 = vmul.f32 %v1917_v16, %v267_v22 }
 0x1d7   :  { %v982_v53 = vrot.slane %v457_v51, %v2064_v46  ;;  %v986_v54 = vrot.slane %v460_v52, %v2064_v46 }
 0x1d9   :  { %v1466_v60 = vsel %vm1453_vm5, %v982_v53, %v1465_v48  ;;  %690 = vadd.xlane.f32.xlu1 %v689_v56  ;;  %693 = vadd.xlane.f32.xlu0 %v692_v57  ;;  %v265_v48 = vld [vmem:[#allocation10 + $0xc4] sm:$0x3]  ;;  %v701_v56 = vsel %vm152_vm2, %v388_v45, 0.0  ;;  %v268_v45 = vld [vmem:[#allocation10 + $0xca] sm:$0x3] }
 0x1da   :  { %v1467_v63 = vsel %vm1455_vm6, %v986_v54, %v1466_v60  ;;  %v475_v0 = vpop.xlane.xlu1 %474  ;;  %v478_v1 = vpop.xlane.xlu0 %477  ;;  %v683_v54 = vsel %vm152_vm2, %v382_v44, 0.0  ;;  %v394_v57 = vmul.f32 %v1917_v16, %v265_v48  ;;  %v260_v60 = vld [vmem:[#allocation10 + $0xba] sm:$0x3]  ;;  %v391_v44 = vmul.f32 %v1917_v16, %v262_v34  ;;  %v274_v48 = vld [vmem:[#allocation10 + $0xd6] sm:$0x3] }
 0x1db   :  { %v1006_v2 = vrot.slane %v475_v0, %v2064_v46  ;;  %v1010_v3 = vrot.slane %v478_v1, %v2064_v46 }
 0x1dd   :  { %v1472_v8 = vsel %vm1451_vm4, %v1010_v3, %v1006_v2  ;;  %660 = vadd.xlane.f32.xlu1 %v659_v4  ;;  %678 = vadd.xlane.f32.xlu0 %v677_v5  ;;  %v719_v3 = vsel %vm152_vm2, %v394_v57, 0.0  ;;  %v686_v4 = vsel %vm152_vm2, %v383_v58, 0.0  ;;  %v389_v5 = vmul.f32 %v1917_v16, %v260_v60  ;;  %v279_v58 = vld [vmem:[#allocation10 + $0xe0] sm:$0x3] }
 0x1de   :  { %v463_v11 = vpop.xlane.xlu1 %462  ;;  %v481_v12 = vpop.xlane.xlu0 %480 }
 0x1df   :  { %v990_v13 = vrot.slane %v463_v11, %v2064_v46  ;;  %v1014_v14 = vrot.slane %v481_v12, %v2064_v46 }
 0x1e1   :  { %v1468_v20 = vsel %vm1457_vm7, %v990_v13, %v1467_v63  ;;  %v1473_v21 = vsel %vm1453_vm5, %v1014_v14, %v1472_v8  ;;  %696 = vadd.xlane.f32.xlu1 %v695_v15  ;;  %663 = vadd.xlane.f32.xlu0 %v662_v17  ;;  %v271_v8 = vld [vmem:[#allocation10 + $0xd0] sm:$0x3]  ;;  %v704_v15 = vsel %vm152_vm2, %v389_v5, 0.0  ;;  %v722_v17 = vsel %vm152_vm2, %v395_v6, 0.0  ;;  %v275_v6 = vld [vmem:[#allocation10 + $0xd8] sm:$0x3] }
 0x1e2   :  { %v466_v24 = vpop.xlane.xlu1 %465  ;;  %v484_v25 = vpop.xlane.xlu0 %483  ;;  %v400_v18 = vmul.f32 %v1917_v16, %v271_v8 }
 0x1e3   :  { %v994_v26 = vrot.slane %v466_v24, %v2064_v46  ;;  %v1018_v27 = vrot.slane %v484_v25, %v2064_v46 }
 0x1e5   :  { %v1474_v32 = vsel %vm1455_vm6, %v1018_v27, %v1473_v21  ;;  %681 = vadd.xlane.f32.xlu1 %v680_v28  ;;  %699 = vadd.xlane.f32.xlu0 %v698_v29  ;;  %v1469_v35 = vsel %vm1459_vm8, %v994_v26, %v1468_v20  ;;  %v261_v21 = vld [vmem:[#allocation10 + $0xbc] sm:$0x3]  ;;  %v737_v28 = vsel %vm152_vm2, %v400_v18, 0.0  ;;  %v740_v29 = vsel %vm152_vm2, %v401_v19, 0.0 }
 0x1e6   :  { %v499_v36 = vpop.xlane.xlu1 %498  ;;  %v502_v37 = vpop.xlane.xlu0 %501  ;;  %v390_v30 = vmul.f32 %v1917_v16, %v261_v21 }
 0x1e7   :  { %v1038_v39 = vrot.slane %v499_v36, %v2064_v46  ;;  %v1042_v41 = vrot.slane %v502_v37, %v2064_v46 }
 0x1e9   :  { %v1479_v47 = vsel %vm1451_vm4, %v1042_v41, %v1038_v39  ;;  %714 = vadd.xlane.f32.xlu1 %v713_v42  ;;  %717 = vadd.xlane.f32.xlu0 %v716_v43  ;;  %v707_v41 = vsel %vm152_vm2, %v390_v30, 0.0  ;;  %v725_v42 = vsel %vm152_vm2, %v396_v31, 0.0  ;;  %v402_v43 = vmul.f32 %v1917_v16, %v273_v33  ;;  %v282_v31 = vld [vmem:[#allocation10 + $0xe6] sm:$0x3] }
 0x1ea   :  { %v469_v50 = vpop.xlane.xlu1 %468  ;;  %v487_v51 = vpop.xlane.xlu0 %486 }
 0x1eb   :  { %v998_v52 = vrot.slane %v469_v50, %v2064_v46  ;;  %v1022_v53 = vrot.slane %v487_v51, %v2064_v46  ;;  %v743_v16 = vsel %vm152_vm2, %v402_v43, 0.0 }
 0x1ed   :  { %v1475_v59 = vsel %vm1457_vm7, %v1022_v53, %v1474_v32  ;;  %684 = vadd.xlane.f32.xlu1 %v683_v54  ;;  %702 = vadd.xlane.f32.xlu0 %v701_v56  ;;  %v1470_v62 = vsel %vm1461_vm9, %v998_v52, %v1469_v35  ;;  %v2194_v52 = vld [vmem:[#allocation2] sm:$0x3]  ;;  %v710_v56 = vsel %vm152_vm2, %v391_v44, 0.0 }
 0x1ee   :  { %v505_v63 = vpop.xlane.xlu1 %504  ;;  %v472_v0 = vpop.xlane.xlu0 %471  ;;  %v397_v53 = vmul.f32 %v2194_v52, %v268_v45  ;;  %v403_v57 = vmul.f32 %v2194_v52, %v274_v48  ;;  %v411_v43 = vmul.f32 %v2194_v52, %v282_v31  ;;  %v287_v45 = vld [vmem:[#allocation10 + $0xf0] sm:$0x3] }
 0x1ef   :  { %v1046_v1 = vrot.slane %v505_v63, %v2064_v46  ;;  %v1002_v2 = vrot.slane %v472_v0, %v2064_v46  ;;  %v408_v63 = vmul.f32 %v2194_v52, %v279_v58  ;;  %v416_v58 = vmul.f32 %v2194_v52, %v287_v45 }
 0x1f1   :  { %v1480_v7 = vsel %vm1453_vm5, %v1046_v1, %v1479_v47  ;;  %720 = vadd.xlane.f32.xlu1 %v719_v3  ;;  %687 = vadd.xlane.f32.xlu0 %v686_v4  ;;  %v2165_v10 = vsel %vm1463_vm10, %v1002_v2, %v1470_v62  ;;  %v728_v1 = vsel %vm152_vm2, %v397_v53, 0.0  ;;  %v746_v2 = vsel %vm152_vm2, %v403_v57, 0.0  ;;  %v269_v4 = vld [vmem:[#allocation10 + $0xcc] sm:$0x3] }
 0x1f2   :  { %v490_v11 = vpop.xlane.xlu1 %489  ;;  %v508_v12 = vpop.xlane.xlu0 %507  ;;  %v398_v9 = vmul.f32 %v2194_v52, %v269_v4  ;;  %v770_v57 = vsel %vm152_vm2, %v411_v43, 0.0  ;;  %v785_v4 = vsel %vm152_vm2, %v416_v58, 0.0 }
 0x1f3   :  { %v1026_v13 = vrot.slane %v490_v11, %v2064_v46  ;;  %v1050_v14 = vrot.slane %v508_v12, %v2064_v46  ;;  %v281_v11 = vld [vmem:[#allocation10 + $0xe4] sm:$0x3] }
 0x1f5   :  { %v1481_v20 = vsel %vm1455_vm6, %v1050_v14, %v1480_v7  ;;  %705 = vadd.xlane.f32.xlu1 %v704_v15  ;;  %723 = vadd.xlane.f32.xlu0 %v722_v17  ;;  %v1476_v23 = vsel %vm1459_vm8, %v1026_v13, %v1475_v59  ;;  %v280_v59 = vld [vmem:[#allocation10 + $0xe2] sm:$0x3]  ;;  %v761_v13 = vsel %vm152_vm2, %v408_v63, 0.0  ;;  %v404_v15 = vmul.f32 %v2194_v52, %v275_v6  ;;  %v270_v17 = vld [vmem:[#allocation10 + $0xce] sm:$0x3] }
 0x1f6   :  { %v523_v24 = vpop.xlane.xlu1 %522  ;;  %v526_v25 = vpop.xlane.xlu0 %525  ;;  %v409_v3 = vmul.f32 %v2194_v52, %v280_v59  ;;  %v283_v63 = vld [vmem:[#allocation10 + $0xe8] sm:$0x3] }
 0x1f7   :  { %v1070_v26 = vrot.slane %v523_v24, %v2064_v46  ;;  %v1074_v27 = vrot.slane %v526_v25, %v2064_v46  ;;  %v399_v24 = vmul.f32 %v2194_v52, %v270_v17 }
 0x1f8   :  { %v764_v14 = vsel %vm152_vm2, %v409_v3, 0.0 }
 0x1f9   :  { %v1486_v32 = vsel %vm1451_vm4, %v1074_v27, %v1070_v26  ;;  %738 = vadd.xlane.f32.xlu1 %v737_v28  ;;  %741 = vadd.xlane.f32.xlu0 %v740_v29  ;;  %v749_v27 = vsel %vm152_vm2, %v404_v15, 0.0  ;;  %v276_v28 = vld [vmem:[#allocation10 + $0xda] sm:$0x3] }
 0x1fa   :  { %v493_v35 = vpop.xlane.xlu1 %492  ;;  %v511_v36 = vpop.xlane.xlu0 %510 }
 0x1fb   :  { %v1030_v37 = vrot.slane %v493_v35, %v2064_v46  ;;  %v1054_v39 = vrot.slane %v511_v36, %v2064_v46 }
 0x1fd   :  { %v1482_v47 = vsel %vm1457_vm7, %v1054_v39, %v1481_v20  ;;  %708 = vadd.xlane.f32.xlu1 %v707_v41  ;;  %726 = vadd.xlane.f32.xlu0 %v725_v42  ;;  %v2190_v49 = vsel %vm1461_vm9, %v1030_v37, %v1476_v23  ;;  %v410_v20 = vmul.f32 %v2194_v52, %v281_v11  ;;  %v731_v23 = vsel %vm152_vm2, %v398_v9, 0.0  ;;  %v289_v9 = vld [vmem:[#allocation10 + $0xf4] sm:$0x3]  ;;  %v278_v11 = vld [vmem:[#allocation10 + $0xde] sm:$0x3] }
 0x1fe   :  { %v529_v50 = vpop.xlane.xlu1 %528  ;;  %v2192_v51 = vpop.xlane.xlu0 %495  ;;  %v405_v37 = vmul.f32 %v2194_v52, %v276_v28  ;;  %v734_v42 = vsel %vm152_vm2, %v399_v24, 0.0 }
 0x1ff   :  { %v1078_v54 = vrot.slane %v529_v50, %v2064_v46  ;;  %v767_v41 = vsel %vm152_vm2, %v410_v20, 0.0  ;;  %v407_v20 = vmul.f32 %v2194_v52, %v278_v11 }
 0x201   :  { %744 = vadd.xlane.f32.xlu1 %v743_v16  ;;  %711 = vadd.xlane.f32.xlu0 %v710_v56  ;;  %v1487_v0 = vsel %vm1453_vm5, %v1078_v54, %v1486_v32  ;;  %v752_v56 = vsel %vm152_vm2, %v405_v37, 0.0 }
 0x202   :  { %v514_v60 = vpop.xlane.xlu1 %513  ;;  %v532_v61 = vpop.xlane.xlu0 %531 }
 0x203   :  { %v1082_v62 = vrot.slane %v532_v61, %v2064_v46  ;;  %v1058_v12 = vrot.slane %v514_v60, %v2064_v46 }
 0x205   :  { %v1488_v5 = vsel %vm1455_vm6, %v1082_v62, %v1487_v0  ;;  %729 = vadd.xlane.f32.xlu1 %v728_v1  ;;  %747 = vadd.xlane.f32.xlu0 %v746_v2  ;;  %v1483_v29 = vsel %vm1459_vm8, %v1058_v12, %v1482_v47  ;;  %v288_v47 = vld [vmem:[#allocation10 + $0xf2] sm:$0x3]  ;;  %v277_v62 = vld [vmem:[#allocation10 + $0xdc] sm:$0x3] }
 0x206   :  { %v547_v7 = vpop.xlane.xlu1 %546  ;;  %v550_v8 = vpop.xlane.xlu0 %549  ;;  %v417_v59 = vmul.f32 %v2194_v52, %v288_v47  ;;  %v406_v6 = vmul.f32 %v2194_v52, %v277_v62 }
 0x207   :  { %v1102_v25 = vrot.slane %v547_v7, %v2064_v46  ;;  %v1106_v26 = vrot.slane %v550_v8, %v2064_v46  ;;  %v412_v7 = vmul.f32 %v2194_v52, %v283_v63 }
 0x208   :  { %v755_v17 = vsel %vm152_vm2, %v406_v6, 0.0 }
 0x209   :  { %762 = vadd.xlane.f32.xlu1 %v761_v13  ;;  %765 = vadd.xlane.f32.xlu0 %v764_v14  ;;  %v1493_v39 = vsel %vm1451_vm4, %v1106_v26, %v1102_v25 }
 0x20a   :  { %v517_v18 = vpop.xlane.xlu1 %516  ;;  %v535_v19 = vpop.xlane.xlu0 %534 }
 0x20b   :  { %v1062_v21 = vrot.slane %v517_v18, %v2064_v46  ;;  %v1086_v22 = vrot.slane %v535_v19, %v2064_v46  ;;  %v773_v18 = vsel %vm152_vm2, %v412_v7, 0.0  ;;  %v418_v19 = vmul.f32 %v2194_v52, %v289_v9 }
 0x20d   :  { %v1489_v30 = vsel %vm1457_vm7, %v1086_v22, %v1488_v5  ;;  %732 = vadd.xlane.f32.xlu1 %v731_v23  ;;  %750 = vadd.xlane.f32.xlu0 %v749_v27  ;;  %v1484_v32 = vsel %vm1461_vm9, %v1062_v21, %v1483_v29  ;;  %v788_v5 = vsel %vm152_vm2, %v417_v59, 0.0  ;;  %v284_v22 = vld [vmem:[#allocation10 + $0xea] sm:$0x3]  ;;  %v290_v23 = vld [vmem:[#allocation10 + $0xf6] sm:$0x3]  ;;  %v791_v29 = vsel %vm152_vm2, %v418_v19, 0.0 }
 0x20e   :  { %v553_v33 = vpop.xlane.xlu1 %552  ;;  %v520_v34 = vpop.xlane.xlu0 %519  ;;  %v413_v31 = vmul.f32 %v2194_v52, %v284_v22 }
 0x20f   :  { %v1110_v35 = vrot.slane %v553_v33, %v2064_v46  ;;  %v1066_v36 = vrot.slane %v520_v34, %v2064_v46  ;;  %v285_v34 = vld [vmem:[#allocation10 + $0xec] sm:$0x3] }
 0x210   :  { %v776_v43 = vsel %vm152_vm2, %v413_v31, 0.0  ;;  %v414_v45 = vmul.f32 %v2194_v52, %v285_v34 }
 0x211   :  { %v1494_v44 = vsel %vm1453_vm5, %v1110_v35, %v1493_v39  ;;  %768 = vadd.xlane.f32.xlu1 %v767_v41  ;;  %735 = vadd.xlane.f32.xlu0 %v734_v42  ;;  %v2233_v48 = vsel %vm1463_vm10, %v1066_v36, %v1484_v32  ;;  %v419_v32 = vmul.f32 %v2194_v52, %v290_v23  ;;  %v291_v35 = vld [vmem:[#allocation10 + $0xf8] sm:$0x3] }
 0x212   :  { %v538_v50 = vpop.xlane.xlu1 %537  ;;  %v556_v53 = vpop.xlane.xlu0 %555  ;;  %v420_v47 = vmul.f32 %v2194_v52, %v291_v35 }
 0x213   :  { %v1090_v54 = vrot.slane %v538_v50, %v2064_v46  ;;  %v1114_v16 = vrot.slane %v556_v53, %v2064_v46 }
 0x215   :  { %v1490_v60 = vsel %vm1459_vm8, %v1090_v54, %v1489_v30  ;;  %v1495_v61 = vsel %vm1455_vm6, %v1114_v16, %v1494_v44  ;;  %753 = vadd.xlane.f32.xlu1 %v752_v56  ;;  %771 = vadd.xlane.f32.xlu0 %v770_v57  ;;  %v758_v30 = vsel %vm152_vm2, %v407_v20, 0.0  ;;  %v794_v44 = vsel %vm152_vm2, %v419_v32, 0.0  ;;  %v286_v54 = vld [vmem:[#allocation10 + $0xee] sm:$0x3]  ;;  %v292_v16 = vld [vmem:[#allocation10 + $0xfa] sm:$0x3] }
 0x216   :  { %v571_v0 = vpop.xlane.xlu1 %570  ;;  %v574_v1 = vpop.xlane.xlu0 %573  ;;  %v415_v62 = vmul.f32 %v2194_v52, %v286_v54  ;;  %v421_v63 = vmul.f32 %v2194_v52, %v292_v16  ;;  %v1618_v32 = vld [vmem:[#allocation3] sm:$0x3] }
 0x217   :  { %v1134_v2 = vrot.slane %v571_v0, %v2064_v46  ;;  %v1138_v3 = vrot.slane %v574_v1, %v2064_v46  ;;  %v293_v1 = vld [vmem:[#allocation10 + $0xfc] sm:$0x3] }
 0x218   :  { %v782_v7 = vsel %vm152_vm2, %v415_v62, 0.0  ;;  %v422_v9 = vmul.f32 %v2194_v52, %v293_v1 }
 0x219   :  { %v1500_v8 = vsel %vm1451_vm4, %v1138_v3, %v1134_v2  ;;  %786 = vadd.xlane.f32.xlu1 %v785_v4  ;;  %789 = vadd.xlane.f32.xlu0 %v788_v5  ;;  %v294_v2 = vld [vmem:[#allocation10 + $0xfe] sm:$0x3] }
 0x21a   :  { %v541_v12 = vpop.xlane.xlu1 %540  ;;  %v559_v13 = vpop.xlane.xlu0 %558  ;;  %v423_v11 = vmul.f32 %v2194_v52, %v294_v2  ;;  %v803_v19 = vsel %vm152_vm2, %v422_v9, 0.0 }
 0x21b   :  { %v1094_v14 = vrot.slane %v541_v12, %v2064_v46  ;;  %v1118_v15 = vrot.slane %v559_v13, %v2064_v46 }
 0x21c   :  { %v806_v20 = vsel %vm152_vm2, %v423_v11, 0.0 }
 0x21d   :  { %v1496_v21 = vsel %vm1457_vm7, %v1118_v15, %v1495_v61  ;;  %756 = vadd.xlane.f32.xlu1 %v755_v17  ;;  %774 = vadd.xlane.f32.xlu0 %v773_v18  ;;  %v1491_v24 = vsel %vm1461_vm9, %v1094_v14, %v1490_v60  ;;  %v779_v60 = vsel %vm152_vm2, %v414_v45, 0.0  ;;  %v797_v61 = vsel %vm152_vm2, %v420_v47, 0.0 }
 0x21e   :  { %v577_v25 = vpop.xlane.xlu1 %576  ;;  %v544_v26 = vpop.xlane.xlu0 %543 }
 0x21f   :  { %v1142_v27 = vrot.slane %v577_v25, %v2064_v46  ;;  %v1098_v28 = vrot.slane %v544_v26, %v2064_v46 }
 0x221   :  { %v1501_v33 = vsel %vm1453_vm5, %v1142_v27, %v1500_v8  ;;  %792 = vadd.xlane.f32.xlu1 %v791_v29  ;;  %759 = vadd.xlane.f32.xlu0 %v758_v30  ;;  %v2266_v36 = vsel %vm1463_vm10, %v1098_v28, %v1491_v24  ;;  %v800_v8 = vsel %vm152_vm2, %v421_v63, 0.0 }
 0x222   :  { %v562_v37 = vpop.xlane.xlu1 %561  ;;  %v580_v39 = vpop.xlane.xlu0 %579 }
 0x223   :  { %v1122_v41 = vrot.slane %v562_v37, %v2064_v46  ;;  %v1146_v42 = vrot.slane %v580_v39, %v2064_v46 }
 0x225   :  { %v1497_v50 = vsel %vm1459_vm8, %v1122_v41, %v1496_v21  ;;  %v1502_v53 = vsel %vm1455_vm6, %v1146_v42, %v1501_v33  ;;  %777 = vadd.xlane.f32.xlu1 %v776_v43  ;;  %795 = vadd.xlane.f32.xlu0 %v794_v44 }
 0x226   :  { %v595_v56 = vpop.xlane.xlu1 %594  ;;  %v598_v57 = vpop.xlane.xlu0 %597 }
 0x227   :  { %v1166_v58 = vrot.slane %v595_v56, %v2064_v46  ;;  %v1170_v59 = vrot.slane %v598_v57, %v2064_v46  ;;  %v1034_v57 = vrot.slane %v2192_v51, %v2064_v46 }
 0x229   :  { %v1507_v0 = vsel %vm1451_vm4, %v1170_v59, %v1166_v58  ;;  %780 = vadd.xlane.f32.xlu1 %v779_v60  ;;  %798 = vadd.xlane.f32.xlu0 %v797_v61  ;;  %v1478_v60 = vsel %vm1463_vm10, %v1034_v57, %v2190_v49 }
 0x22a   :  { %v565_v3 = vpop.xlane.xlu1 %564  ;;  %v583_v4 = vpop.xlane.xlu0 %582 }
 0x22b   :  { %v1126_v5 = vrot.slane %v565_v3, %v2064_v46  ;;  %v1150_v6 = vrot.slane %v583_v4, %v2064_v46 }
 0x22d   :  { %v2290_v12 = vsel %vm1457_vm7, %v1150_v6, %v1502_v53  ;;  %783 = vadd.xlane.f32.xlu1 %v782_v7  ;;  %801 = vadd.xlane.f32.xlu0 %v800_v8  ;;  %v1498_v13 = vsel %vm1461_vm9, %v1126_v5, %v1497_v50 }
 0x22e   :  { %v601_v14 = vpop.xlane.xlu1 %600  ;;  %v568_v15 = vpop.xlane.xlu0 %567 }
 0x22f   :  { %v1174_v17 = vrot.slane %v601_v14, %v2064_v46  ;;  %v1130_v18 = vrot.slane %v568_v15, %v2064_v46 }
 0x231   :  { %v1508_v21 = vsel %vm1453_vm5, %v1174_v17, %v1507_v0  ;;  %804 = vadd.xlane.f32.xlu1 %v803_v19  ;;  %807 = vadd.xlane.f32.xlu0 %v806_v20  ;;  %v1499_v52 = vsel %vm1463_vm10, %v1130_v18, %v1498_v13 }
 0x232   :  { %v586_v22 = vpop.xlane.xlu1 %585  ;;  %v604_v23 = vpop.xlane.xlu0 %603 }
 0x233   :  { %v1178_v24 = vrot.slane %v604_v23, %v2064_v46  ;;  %v1154_v0 = vrot.slane %v586_v22, %v2064_v46 }
 0x235   :  { %v1509_v25 = vsel %vm1455_vm6, %v1178_v24, %v1508_v21  ;;  %v1504_v4 = vsel %vm1459_vm8, %v1154_v0, %v2290_v12 }
 0x236   :  { %v2301_v26 = vpop.xlane.xlu1 %618  ;;  %v2303_v27 = vpop.xlane.xlu0 %621 }
 0x237   :  { %v1202_v5 = vrot.slane %v2303_v27, %v2064_v46 }
 0x23a   :  { %v589_v28 = vpop.xlane.xlu1 %588  ;;  %v607_v29 = vpop.xlane.xlu0 %606 }
 0x23b   :  { %v1158_v49 = vrot.slane %v589_v28, %v2064_v46  ;;  %v1182_v2 = vrot.slane %v607_v29, %v2064_v46 }
 0x23d   :  { %v1505_v9 = vsel %vm1461_vm9, %v1158_v49, %v1504_v4  ;;  %v1510_v14 = vsel %vm1457_vm7, %v1182_v2, %v1509_v25 }
 0x23e   :  { %v2305_v30 = vpop.xlane.xlu1 %624  ;;  %v592_v31 = vpop.xlane.xlu0 %591 }
 0x23f   :  { %v1162_v1 = vrot.slane %v592_v31, %v2064_v46  ;;  %v1206_v7 = vrot.slane %v2305_v30, %v2064_v46 }
 0x241   :  { %v1506_v13 = vsel %vm1463_vm10, %v1162_v1, %v1505_v9 }
 0x242   :  { %1621 = vperm.xlu1 %1704, %v1618_v32   ;;  %v610_v33 = vpop.xlane.xlu1 %609  ;;  %v2307_v34 = vpop.xlane.xlu0 %627 }
 0x243   :  { %v1186_v6 = vrot.slane %v610_v33, %v2064_v46  ;;  %v1210_v11 = vrot.slane %v2307_v34, %v2064_v46 }
 0x246   :  { %v2309_v35 = vpop.xlane.xlu1 %642  ;;  %v2311_v37 = vpop.xlane.xlu0 %645 }
 0x247   :  { %v1230_v15 = vrot.slane %v2309_v35, %v2064_v46  ;;  %v1234_v17 = vrot.slane %v2311_v37, %v2064_v46 }
 0x249   :  { %v1521_v31 = vsel %vm1451_vm4, %v1234_v17, %v1230_v15 }
 0x24a   :  { %v613_v39 = vpop.xlane.xlu1 %612  ;;  %v2313_v41 = vpop.xlane.xlu0 %630 }
 0x24b   :  { %v1190_v8 = vrot.slane %v613_v39, %v2064_v46  ;;  %v1214_v18 = vrot.slane %v2313_v41, %v2064_v46 }
 0x24e   :  { %v2315_v42 = vpop.xlane.xlu1 %648  ;;  %v616_v43 = vpop.xlane.xlu0 %615 }
 0x24f   :  { %v1194_v12 = vrot.slane %v616_v43, %v2064_v46  ;;  %v1238_v24 = vrot.slane %v2315_v42, %v2064_v46 }
 0x251   :  { %v1522_v43 = vsel %vm1453_vm5, %v1238_v24, %v1521_v31 }
 0x252   :  { %v2317_v44 = vpop.xlane.xlu1 %633  ;;  %v2319_v45 = vpop.xlane.xlu0 %651 }
 0x253   :  { %v1218_v22 = vrot.slane %v2317_v44, %v2064_v46  ;;  %v1242_v28 = vrot.slane %v2319_v45, %v2064_v46 }
 0x256   :  { %v2321_v47 = vpop.xlane.xlu1 %666  ;;  %v2323_v50 = vpop.xlane.xlu0 %669 }
 0x257   :  { %v1262_v39 = vrot.slane %v2321_v47, %v2064_v46  ;;  %v1266_v41 = vrot.slane %v2323_v50, %v2064_v46 }
 0x25a   :  { %v2325_v53 = vpop.xlane.xlu1 %636  ;;  %v2327_v54 = vpop.xlane.xlu0 %654 }
 0x25b   :  { %v1222_v25 = vrot.slane %v2325_v53, %v2064_v46  ;;  %v1246_v33 = vrot.slane %v2327_v54, %v2064_v46  ;;  %v1523_v54 = vsel %vm1455_vm6, %v1242_v28, %v1522_v43 }
 0x25d   :  { %v1524_v57 = vsel %vm1457_vm7, %v1246_v33, %v1523_v54 }
 0x25e   :  { %v2329_v16 = vpop.xlane.xlu1 %672  ;;  %1586 = vxpose.xlu0.b32.start [1/16] (narrow) %v2102_v40, 8  ;;  %v2332_v56 = vpop.xlane.xlu0 %639 }
 0x25f   :  { %v1226_v29 = vrot.slane %v2332_v56, %v2064_v46  ;;  %v1270_v44 = vrot.slane %v2329_v16, %v2064_v46 }
 0x262   :  { %v2336_v58 = vpop.xlane.xlu1 %657  ;;  %1587 = vxpose.xlu0.b32.cont [2/16] (narrow) %v2165_v10, 8  ;;  %v2339_v59 = vpop.xlane.xlu0 %675 }
 0x263   :  { %v1250_v42 = vrot.slane %v2336_v58, %v2064_v46  ;;  %v1274_v47 = vrot.slane %v2339_v59, %v2064_v46 }
 0x265   :  { %v1525_v0 = vsel %vm1459_vm8, %v1250_v42, %v1524_v57 }
 0x266   :  { %v2343_v61 = vpop.xlane.xlu1 %690  ;;  %1588 = vxpose.xlu0.b32.cont [3/16] (narrow) %v1478_v60, 8  ;;  %v2345_v62 = vpop.xlane.xlu0 %693 }
 0x26a   :  { %v2347_v40 = vpop.xlane.xlu1 %660  ;;  %1589 = vxpose.xlu0.b32.cont [4/16] (narrow) %v2233_v48, 8  ;;  %v2350_v63 = vpop.xlane.xlu0 %678 }
 0x26b   :  { %v1254_v45 = vrot.slane %v2347_v40, %v2064_v46  ;;  %v1278_v16 = vrot.slane %v2350_v63, %v2064_v46  ;;  %v1528_v40 = vsel %vm1451_vm4, %v1266_v41, %v1262_v39 }
 0x26c   :  { %v1529_v49 = vsel %vm1453_vm5, %v1270_v44, %v1528_v40 }
 0x26d   :  { %v1526_v1 = vsel %vm1461_vm9, %v1254_v45, %v1525_v0  ;;  %v1530_v2 = vsel %vm1455_vm6, %v1274_v47, %v1529_v49 }
 0x26e   :  { %v2352_v51 = vpop.xlane.xlu1 %696  ;;  %1590 = vxpose.xlu0.b32.cont [5/16] (narrow) %v2266_v36, 8  ;;  %v2355_v10 = vpop.xlane.xlu0 %663  ;;  %v1198_v36 = vrot.slane %v2301_v26, %v2064_v46 }
 0x26f   :  { %v1258_v50 = vrot.slane %v2355_v10, %v2064_v46 }
 0x270   :  { %v1514_v21 = vsel %vm1451_vm4, %v1202_v5, %v1198_v36  ;;  %v1531_v36 = vsel %vm1457_vm7, %v1278_v16, %v1530_v2 }
 0x271   :  { %v1515_v23 = vsel %vm1453_vm5, %v1206_v7, %v1514_v21  ;;  %v1527_v4 = vsel %vm1463_vm10, %v1258_v50, %v1526_v1 }
 0x272   :  { %v2361_v3 = vpop.xlane.xlu1 %681  ;;  %1591 = vxpose.xlu0.b32.cont [6/16] (narrow) %v1499_v52, 8  ;;  %v2363_v48 = vpop.xlane.xlu0 %699  ;;  %v1511_v52 = vsel %vm1459_vm8, %v1186_v6, %v1510_v14  ;;  %v1516_v27 = vsel %vm1455_vm6, %v1210_v11, %v1515_v23  ;;  %v1302_v14 = vrot.slane %v2352_v51, %v2064_v46 }
 0x273   :  { %v1512_v26 = vsel %vm1461_vm9, %v1190_v8, %v1511_v52  ;;  %v1517_v32 = vsel %vm1457_vm7, %v1214_v18, %v1516_v27  ;;  %v1282_v59 = vrot.slane %v2361_v3, %v2064_v46  ;;  %v1306_v15 = vrot.slane %v2363_v48, %v2064_v46 }
 0x274   :  { %v1513_v30 = vsel %vm1463_vm10, %v1194_v12, %v1512_v26  ;;  %v1518_v37 = vsel %vm1459_vm8, %v1218_v22, %v1517_v32  ;;  %v1294_v12 = vrot.slane %v2343_v61, %v2064_v46 }
 0x275   :  { %v1519_v53 = vsel %vm1461_vm9, %v1222_v25, %v1518_v37  ;;  %v1532_v7 = vsel %vm1459_vm8, %v1282_v59, %v1531_v36 }
 0x276   :  { %v2387_v19 = vpop.xlane.xlu1 %714  ;;  %1592 = vxpose.xlu0.b32.cont [7/16] (narrow) %v1506_v13, 8  ;;  %v2389_v20 = vpop.xlane.xlu0 %717  ;;  %v1520_v56 = vsel %vm1463_vm10, %v1226_v29, %v1519_v53  ;;  %v1298_v13 = vrot.slane %v2345_v62, %v2064_v46 }
 0x277   :  { %v1326_v33 = vrot.slane %v2387_v19, %v2064_v46 }
 0x278   :  { %v1535_v52 = vsel %vm1451_vm4, %v1298_v13, %v1294_v12 }
 0x279   :  { %v1536_v23 = vsel %vm1453_vm5, %v1302_v14, %v1535_v52 }
 0x27a   :  { %v685_v34 = vpop.xlane.xlu1 %684  ;;  %1593 = vxpose.xlu0.b32.cont [8/16] (narrow) %v1513_v30, 8  ;;  %v703_v35 = vpop.xlane.xlu0 %702  ;;  %v1537_v62 = vsel %vm1455_vm6, %v1306_v15, %v1536_v23 }
 0x27b   :  { %v1286_v10 = vrot.slane %v685_v34, %v2064_v46  ;;  %v1310_v17 = vrot.slane %v703_v35, %v2064_v46  ;;  %v1330_v34 = vrot.slane %v2389_v20, %v2064_v46 }
 0x27d   :  { %v1533_v3 = vsel %vm1461_vm9, %v1286_v10, %v1532_v7  ;;  %v1538_v24 = vsel %vm1457_vm7, %v1310_v17, %v1537_v62  ;;  %v1542_v43 = vsel %vm1451_vm4, %v1330_v34, %v1326_v33 }
 0x27e   :  { %v721_v58 = vpop.xlane.xlu1 %720  ;;  %1594 = vxpose.xlu0.b32.cont [9/16] (narrow) %v1520_v56, 8  ;;  %v688_v60 = vpop.xlane.xlu0 %687 }
 0x27f   :  { %v1290_v63 = vrot.slane %v688_v60, %v2064_v46  ;;  %v1334_v35 = vrot.slane %v721_v58, %v2064_v46 }
 0x281   :  { %v1534_v8 = vsel %vm1463_vm10, %v1290_v63, %v1533_v3  ;;  %v1543_v45 = vsel %vm1453_vm5, %v1334_v35, %v1542_v43 }
 0x282   :  { %v706_v5 = vpop.xlane.xlu1 %705  ;;  %1595 = vxpose.xlu0.b32.cont [10/16] (narrow) %v1527_v4, 8  ;;  %v724_v6 = vpop.xlane.xlu0 %723 }
 0x283   :  { %v1314_v22 = vrot.slane %v706_v5, %v2064_v46  ;;  %v1338_v37 = vrot.slane %v724_v6, %v2064_v46 }
 0x285   :  { %v1539_v48 = vsel %vm1459_vm8, %v1314_v22, %v1538_v24  ;;  %v1544_v19 = vsel %vm1455_vm6, %v1338_v37, %v1543_v45 }
 0x286   :  { %v739_v9 = vpop.xlane.xlu1 %738  ;;  %1596 = vxpose.xlu0.b32.cont [11/16] (narrow) %v1534_v8, 8  ;;  %v742_v11 = vpop.xlane.xlu0 %741 }
 0x287   :  { %v1358_v59 = vrot.slane %v739_v9, %v2064_v46  ;;  %v1362_v49 = vrot.slane %v742_v11, %v2064_v46 }
 0x289   :  { %v1549_v36 = vsel %vm1451_vm4, %v1362_v49, %v1358_v59 }
 0x28a   :  { %v709_v18 = vpop.xlane.xlu1 %708  ;;  %v727_v21 = vpop.xlane.xlu0 %726 }
 0x28b   :  { %v1318_v61 = vrot.slane %v709_v18, %v2064_v46  ;;  %v1342_v39 = vrot.slane %v727_v21, %v2064_v46 }
 0x28d   :  { %v1540_v27 = vsel %vm1461_vm9, %v1318_v61, %v1539_v48  ;;  %v1545_v20 = vsel %vm1457_vm7, %v1342_v39, %v1544_v19 }
 0x28e   :  { %v745_v51 = vpop.xlane.xlu1 %744  ;;  %v712_v25 = vpop.xlane.xlu0 %711 }
 0x28f   :  { %v1322_v26 = vrot.slane %v712_v25, %v2064_v46  ;;  %v1366_v10 = vrot.slane %v745_v51, %v2064_v46 }
 0x291   :  { %v1541_v28 = vsel %vm1463_vm10, %v1322_v26, %v1540_v27  ;;  %v1550_v6 = vsel %vm1453_vm5, %v1366_v10, %v1549_v36 }
 0x292   :  { %v730_v29 = vpop.xlane.xlu1 %729  ;;  %1597 = vxpose.xlu0.b32.cont [12/16] (narrow) %v1541_v28, 8  ;;  %v748_v30 = vpop.xlane.xlu0 %747 }
 0x293   :  { %v1346_v44 = vrot.slane %v730_v29, %v2064_v46  ;;  %v1370_v1 = vrot.slane %v748_v30, %v2064_v46 }
 0x295   :  { %v1546_v50 = vsel %vm1459_vm8, %v1346_v44, %v1545_v20  ;;  %v1551_v3 = vsel %vm1455_vm6, %v1370_v1, %v1550_v6 }
 0x296   :  { %v763_v31 = vpop.xlane.xlu1 %762  ;;  %v766_v32 = vpop.xlane.xlu0 %765 }
 0x297   :  { %v1390_v21 = vrot.slane %v763_v31, %v2064_v46  ;;  %v1394_v52 = vrot.slane %v766_v32, %v2064_v46 }
 0x299   :  { %v1556_v51 = vsel %vm1451_vm4, %v1394_v52, %v1390_v21 }
 0x29a   :  { %v733_v41 = vpop.xlane.xlu1 %732  ;;  %v751_v42 = vpop.xlane.xlu0 %750 }
 0x29b   :  { %v1350_v53 = vrot.slane %v733_v41, %v2064_v46  ;;  %v1374_v2 = vrot.slane %v751_v42, %v2064_v46 }
 0x29d   :  { %v1547_v57 = vsel %vm1461_vm9, %v1350_v53, %v1546_v50  ;;  %v1552_v8 = vsel %vm1457_vm7, %v1374_v2, %v1551_v3 }
 0x29e   :  { %v769_v54 = vpop.xlane.xlu1 %768  ;;  %v736_v47 = vpop.xlane.xlu0 %735 }
 0x29f   :  { %v1354_v56 = vrot.slane %v736_v47, %v2064_v46  ;;  %v1398_v22 = vrot.slane %v769_v54, %v2064_v46 }
 0x2a1   :  { %v1548_v16 = vsel %vm1463_vm10, %v1354_v56, %v1547_v57  ;;  %v1557_v48 = vsel %vm1453_vm5, %v1398_v22, %v1556_v51 }
 0x2a2   :  { %v754_v58 = vpop.xlane.xlu1 %753  ;;  %1598 = vxpose.xlu0.b32.cont [13/16] (narrow) %v1548_v16, 8  ;;  %v772_v60 = vpop.xlane.xlu0 %771 }
 0x2a3   :  { %v1378_v5 = vrot.slane %v754_v58, %v2064_v46  ;;  %v1402_v23 = vrot.slane %v772_v60, %v2064_v46 }
 0x2a5   :  { %v1553_v12 = vsel %vm1459_vm8, %v1378_v5, %v1552_v8  ;;  %v1558_v29 = vsel %vm1455_vm6, %v1402_v23, %v1557_v48 }
 0x2a6   :  { %v787_v40 = vpop.xlane.xlu1 %786  ;;  %v790_v0 = vpop.xlane.xlu0 %789 }
 0x2a7   :  { %v1422_v26 = vrot.slane %v787_v40, %v2064_v46  ;;  %v1426_v27 = vrot.slane %v790_v0, %v2064_v46 }
 0x2a9   :  { %v1563_v41 = vsel %vm1451_vm4, %v1426_v27, %v1422_v26 }
 0x2aa   :  { %v757_v63 = vpop.xlane.xlu1 %756  ;;  %v775_v4 = vpop.xlane.xlu0 %774 }
 0x2ab   :  { %v1382_v7 = vrot.slane %v757_v63, %v2064_v46  ;;  %v1406_v61 = vrot.slane %v775_v4, %v2064_v46 }
 0x2ad   :  { %v1554_v14 = vsel %vm1461_vm9, %v1382_v7, %v1553_v12  ;;  %v1559_v31 = vsel %vm1457_vm7, %v1406_v61, %v1558_v29 }
 0x2ae   :  { %v793_v9 = vpop.xlane.xlu1 %792  ;;  %v760_v11 = vpop.xlane.xlu0 %759 }
 0x2af   :  { %v1386_v13 = vrot.slane %v760_v11, %v2064_v46  ;;  %v1430_v30 = vrot.slane %v793_v9, %v2064_v46 }
 0x2b1   :  { %v1555_v15 = vsel %vm1463_vm10, %v1386_v13, %v1554_v14  ;;  %v1564_v44 = vsel %vm1453_vm5, %v1430_v30, %v1563_v41 }
 0x2b2   :  { %v778_v17 = vpop.xlane.xlu1 %777  ;;  %1599 = vxpose.xlu0.b32.cont [14/16] (narrow) %v1555_v15, 8  ;;  %v796_v18 = vpop.xlane.xlu0 %795 }
 0x2b3   :  { %v1410_v25 = vrot.slane %v778_v17, %v2064_v46  ;;  %v1434_v32 = vrot.slane %v796_v18, %v2064_v46 }
 0x2b5   :  { %v1560_v35 = vsel %vm1459_vm8, %v1410_v25, %v1559_v31  ;;  %v1565_v53 = vsel %vm1455_vm6, %v1434_v32, %v1564_v44 }
 0x2b6   :  { %v781_v62 = vpop.xlane.xlu1 %780  ;;  %v799_v24 = vpop.xlane.xlu0 %798 }
 0x2b7   :  { %v1414_v28 = vrot.slane %v781_v62, %v2064_v46  ;;  %v1438_v37 = vrot.slane %v799_v24, %v2064_v46 }
 0x2b9   :  { %v1561_v43 = vsel %vm1461_vm9, %v1414_v28, %v1560_v35  ;;  %v1566_v54 = vsel %vm1457_vm7, %v1438_v37, %v1565_v53 }
 0x2ba   :  { %v784_v33 = vpop.xlane.xlu1 %783  ;;  %v802_v34 = vpop.xlane.xlu0 %801 }
 0x2bb   :  { %v1418_v39 = vrot.slane %v784_v33, %v2064_v46  ;;  %v1442_v42 = vrot.slane %v802_v34, %v2064_v46 }
 0x2bd   :  { %v1562_v45 = vsel %vm1463_vm10, %v1418_v39, %v1561_v43  ;;  %v1567_v56 = vsel %vm1459_vm8, %v1442_v42, %v1566_v54 }
 0x2be   :  { %v805_v19 = vpop.xlane.xlu1 %804  ;;  %1600 = vxpose.xlu0.b32.cont [15/16] (narrow) %v1562_v45, 8  ;;  %v808_v20 = vpop.xlane.xlu0 %807 }
 0x2bf   :  { %v1446_v47 = vrot.slane %v805_v19, %v2064_v46  ;;  %v1450_v50 = vrot.slane %v808_v20, %v2064_v46 }
 0x2c1   :  { %v1568_v57 = vsel %vm1461_vm9, %v1446_v47, %v1567_v56 }
 0x2c2   :  { %v1569_v16 = vsel %vm1463_vm10, %v1450_v50, %v1568_v57  ;;  %v1622_v58 = vpop.permute.xlu1 %1621 }
 0x2c3   :  { %1601 = vxpose.xlu0.b32.end [16/16] (narrow) %v1569_v16, 8 }
 0x2ec   :  { %1705 = vset.pattern.permute.xlu0 %v1840_v55 }
 0x307   :  { %v1602_v60 = vpop.trf.xlu0 }
 0x308   :  { %v1624_v40 = vadd.f32 %v1622_v58, %v1602_v60 }
 0x30a   :  { %1629 = vst [vmem:[#allocation12] sm:$0x3] %v1624_v40 }
 0x311   :  { %v1633_v0 = vld [vmem:[#allocation12] sm:$0x3] }
 0x312   :  { %v1635_v59 = vsel %vm1634_vm11, %v1633_v0, -inf }
 0x313   :  { %v1637_v49 = vsel %vm1636_vm12, %v1635_v59, -inf }
 0x314   :  { %1638 = vmax.xlane.f32.xlu1 %v1637_v49 }
 0x3a1   :  { %v1639_v46 = vpop.xlane.xlu1 %1638 }
 0x3a2   :  { %v1640_v10 = vsub.f32 %v1635_v59, %v1639_v46 }
 0x3a4   :  { %v1641_v1 = vmul.f32 1.442695, %v1640_v10 }
 0x3a6   :  { %1706 = vpow2.f32 %v1641_v1 }
 0x3b0   :  { %v1707_v2 = vpop.eup %1706 }
 0x3b1   :  { %v1643_v63 = vsel %vm1636_vm12, %v1707_v2, 0.0 }
 0x3b2   :  { %1644 = vadd.xlane.f32.xlu1 %v1643_v63 }
 0x43f   :  { %v1645_v4 = vpop.xlane.xlu1 %1644 }
 0x440   :  { %1708 = vrcp.f32 %v1645_v4 }
 0x44a   :  { %v1709_v55 = vpop.eup %1708 }
 0x44b   :  { %v1647_v36 = vmul.f32 %v1709_v55, %v1707_v2 }
 0x44d   :  { %1648 = vst [vmem:[#allocation12] sm:$0x3] %v1647_v36 }
 0x44e   :  { %1810 = shalt.err (!%p1807_p8)
}
 0x44f   :  { %s1811_s16 = scalar_lea.hbm %s2546_s4, 32 }
 0x450   :  { %p1812_p9 = scmp.ne.s32.totalorder %s2546_s4, %s1811_s16  ;;  %p1815_p10 = scmp.lt.u32.totalorder %s1811_s16, %s2546_s4 }
 0x452   :  { %p1817_p11 = pnand %p1815_p10, %p1812_p9 }
 0x454   :  { %1820 = shalt.err (!%p1817_p11)
}
 0x455   :  { %1658 = dma.vmem_to_hbm [thread:$0]  %s1656_s13, 32, %s2546_s4, [#allocation6]  }
 0x456   :  { %1827 = dma.done.wait [#allocation6], 32  }
 0x457   :  { %1828 = vsyncadd [#allocation6], 4294967264 }
 0x458   :  { %1662 = vsyncpa [#allocation5], 1 }
 0x459   :  { %1663 = vsyncpa [#allocation8], 1 }
 0x45a   :  { %1664 = vsyncpa [#allocation11], 1 }
 0x45b   :  { %1665 = vsyncpa [#allocation6], 1 }

</bundles_post_ra>
